<compile_context>
chip_gen: v7x
topology: tpu7x:2x2x1
jax: 0.10.0
libtpu: 0.0.40
codegen_flags: <defaults>
</compile_context>

<pallas_src>
import jax
import jax.numpy as jnp
import numpy as np
from jax.experimental import pallas as pl
from jax.experimental.pallas import tpu as pltpu


# ----------------------------------------------------------------------------
# Pallas kernel: one batch *block* per grid step.
# ----------------------------------------------------------------------------
def _tgm_kernel(x_ref, w123t_ref, wh_ref, bh_ref, wc_ref, bc_ref, out_ref):
    bt = x_ref.shape[0]            # batch elements in this block (static)
    n_sub = w123t_ref.shape[0]     # c: number of sub-event output channels

    for b in range(bt):            # static unroll (bt is small)
        xb = x_ref[b]              # (D, T) bf16, time T on the lane axis

        # --- 3 stacked TGM layers folded offline into one temporal operator per
        #     output channel; torch.max(sub_event, dim=1)[0] as a running max. ---
        se = jnp.dot(xb, w123t_ref[0], preferred_element_type=jnp.float32)
        for ci in range(1, n_sub):
            se = jnp.maximum(
                se, jnp.dot(xb, w123t_ref[ci], preferred_element_type=jnp.float32))

        # --- dropout == identity (inference); relu(cat([f, sub_event], dim=1)) ---
        f_r = jnp.maximum(xb, 0.0)                              # (D, T) bf16
        se_r = jnp.maximum(se, 0.0).astype(jnp.bfloat16)        # (D, T) bf16
        cls = jnp.concatenate([f_r, se_r], axis=0)              # (2D, T) bf16

        # --- h: Conv1d(2D -> 512, k=1) + ReLU  (single fused matmul) ---
        y = jnp.dot(wh_ref[...], cls,
                    preferred_element_type=jnp.float32) + bh_ref[...]   # (512, T)
        y = jnp.maximum(y, 0.0).astype(jnp.bfloat16)

        # --- classify: Conv1d(512 -> classes, k=1); lane-dense (classes, T) ---
        out = jnp.dot(wc_ref[...], y,
                      preferred_element_type=jnp.float32) + bc_ref[...]  # (classes, T)
        out_ref[b] = out.astype(out_ref.dtype)


# ----------------------------------------------------------------------------
# Parameter setup / glue (plain JAX, parameter-only precompute).
# ----------------------------------------------------------------------------
def _tgm_conv_kernels(p, c_in, c_out, length):
    """TGM temporal kernels: Cauchy bumps (TSF) mixed by soft attention."""
    centers = (length - 1) * (jnp.tanh(p["center"]) + 1.0) / 2.0        # (num_f,)
    gammas = jnp.exp(1.5 - 2.0 * jnp.abs(jnp.tanh(p["gamma"])))          # (num_f,)
    # (p["delta"] exists in the reference TSF but is multiplied by zeros -> unused)
    t = jnp.arange(length, dtype=jnp.float32)
    f = (t[None, :] - centers[:, None]) / gammas[:, None]
    f = 1.0 / (jnp.pi * gammas[:, None] * (f * f + 1.0))
    f = f / (jnp.sum(f, axis=1, keepdims=True) + 1e-6)                   # (num_f, L)
    attn = jax.nn.softmax(p["attn"], axis=-1)                            # (c_out*c_in, num_f)
    k = attn @ f                                                         # (c_out*c_in, L)
    return k.reshape(c_out, c_in, length)


def _band_matrix(k, T):
    """Fold conv-over-time (zero pad, stride 1) + channel mixing into (Cout*T, Cin*T)."""
    c_out, c_in, L = k.shape
    p = L // 2
    W = jnp.zeros((c_out * T, c_in * T), jnp.float32)
    for l in range(L):
        W = W + jnp.kron(k[:, :, l], jnp.eye(T, k=l - p, dtype=jnp.float32))
    return W


def init_params(key, inp, classes=8, num_f=16, c=8, hidden=512):
    keys = jax.random.split(key, 7)

    def tgm_p(k, c_in, c_out):
        k1, k2, k3, k4 = jax.random.split(k, 4)
        return {"center": 0.5 * jax.random.normal(k1, (num_f,), jnp.float32),
                "delta": 0.01 * jax.random.normal(k2, (num_f,), jnp.float32),
                "gamma": 1e-4 * jax.random.normal(k3, (num_f,), jnp.float32),
                "attn": 0.01 * jax.random.normal(k4, (c_out * c_in, num_f), jnp.float32)}

    return {
        "sub1": tgm_p(keys[0], 1, c),
        "sub2": tgm_p(keys[1], c, c),
        "sub3": tgm_p(keys[2], c, c),
        "h_w": (1.0 / np.sqrt(2 * inp)) * jax.random.normal(keys[3], (hidden, 2 * inp), jnp.float32),
        "h_b": 0.01 * jax.random.normal(keys[4], (hidden,), jnp.float32),
        "c_w": (1.0 / np.sqrt(hidden)) * jax.random.normal(keys[5], (classes, hidden), jnp.float32),
        "c_b": 0.01 * jax.random.normal(keys[6], (classes,), jnp.float32),
    }


def tgm_model_forward(x, params, classes=8, length=5, c=8, batch_block=2):
    """x mimics inp[0] of the PyTorch forward: shape (B, 1, D, T)."""
    f = x[:, 0]                                   # .squeeze() (B>1 case)  -> (B, D, T)
    B, D, T = f.shape
    bt = batch_block if (batch_block > 0 and B % batch_block == 0) else 1

    # --- parameter-only precompute: compose the 3 TGM banded operators exactly ---
    k1 = _tgm_conv_kernels(params["sub1"], 1, c, length)    # (c, 1, L)
    k2 = _tgm_conv_kernels(params["sub2"], c, c, length)    # (c, c, L)
    k3 = _tgm_conv_kernels(params["sub3"], c, c, length)    # (c, c, L)
    W1 = _band_matrix(k1, T)                                 # (c*T, T)
    W2 = _band_matrix(k2, T)                                 # (c*T, c*T)
    W3 = _band_matrix(k3, T)                                 # (c*T, c*T)
    hi = jax.lax.Precision.HIGHEST
    W123 = jnp.matmul(W3, jnp.matmul(W2, W1, precision=hi), precision=hi)  # (c*T, T)
    # Per-output-channel temporal operators, transposed for (D, T) @ (T, T).
    w123t = jnp.transpose(W123.reshape(c, T, T), (0, 2, 1)).astype(jnp.bfloat16)

    wh = params["h_w"].astype(jnp.bfloat16)                  # (512, 2D)  fused 1x1 conv
    bh = params["h_b"].reshape(-1, 1).astype(jnp.float32)    # (512, 1)
    wc = params["c_w"].astype(jnp.bfloat16)                  # (classes, 512)
    bc = params["c_b"].reshape(-1, 1).astype(jnp.float32)    # (classes, 1)

    x_dt = f.astype(jnp.bfloat16)                            # native (B, D, T) layout

    out = pl.pallas_call(
        _tgm_kernel,
        out_shape=jax.ShapeDtypeStruct((B, classes, T), jnp.float32),
        grid=(B // bt,),
        in_specs=[
            pl.BlockSpec((bt, D, T), lambda i: (i, 0, 0)),
            pl.BlockSpec(w123t.shape, lambda i: (0, 0, 0)),
            pl.BlockSpec(wh.shape, lambda i: (0, 0)),
            pl.BlockSpec(bh.shape, lambda i: (0, 0)),
            pl.BlockSpec(wc.shape, lambda i: (0, 0)),
            pl.BlockSpec(bc.shape, lambda i: (0, 0)),
        ],
        out_specs=pl.BlockSpec((bt, classes, T), lambda i: (i, 0, 0)),
        compiler_params=pltpu.CompilerParams(dimension_semantics=("parallel",)),
    )(x_dt, w123t, wh, bh, wc, bc)

    return out                                    # (B, classes, T), like PyTorch


# ----------------------------------------------------------------------------
# Pure-JAX reference (independent formulation) for a sanity check.
# ----------------------------------------------------------------------------
def reference_forward(x, params, classes=8, length=5, c=8):
    f = x[:, 0]                                   # (B, D, T)
    B, D, T = f.shape
    k1 = _tgm_conv_kernels(params["sub1"], 1, c, length)
    k2 = _tgm_conv_kernels(params["sub2"], c, c, length)
    k3 = _tgm_conv_kernels(params["sub3"], c, c, length)
    p = length // 2

    def tgm(xin, k):   # xin (B, Cin, D, T), k (Cout, Cin, L): conv2d kernel (1, L), pad (0, p)
        xp = jnp.pad(xin, ((0, 0), (0, 0), (0, 0), (p, p)))
        out = jnp.zeros((xin.shape[0], k.shape[0], xin.shape[2], xin.shape[3]), jnp.float32)
        for l in range(k.shape[2]):
            out = out + jnp.einsum("oi,bidt->bodt", k[:, :, l],
                                   xp[:, :, :, l:l + xin.shape[3]],
                                   precision=jax.lax.Precision.HIGHEST)
        return out

    s = tgm(f[:, None], k1)
    s = tgm(s, k2)
    s = tgm(s, k3)
    se = jnp.max(s, axis=1)                                  # (B, D, T)
    cls = jax.nn.relu(jnp.concatenate([f, se], axis=1))      # (B, 2D, T)
    y = jax.nn.relu(jnp.einsum("oc,bct->bot", params["h_w"], cls,
                               precision=jax.lax.Precision.HIGHEST)
                    + params["h_b"][None, :, None])
    return (jnp.einsum("oc,bct->bot", params["c_w"], y,
                       precision=jax.lax.Precision.HIGHEST)
            + params["c_b"][None, :, None])


if __name__ == "__main__":
    B, D, T, classes = 4, 32, 16, 8               # inp (feature dim) = 32
    key = jax.random.PRNGKey(0)
    pkey, xkey = jax.random.split(key)
    params = init_params(pkey, D, classes=classes)
    # mimics the PyTorch forward's inp[0]: shape (B, 1, D, T); the wrapper squeezes it.
    x = jax.random.normal(xkey, (B, 1, D, T), jnp.float32)

    fwd = jax.jit(lambda xx, pp: tgm_model_forward(xx, pp, classes=classes,
                                                   batch_block=2))
    out = jax.block_until_ready(fwd(x, params))
    assert out.shape == (B, classes, T), out.shape

    ref = np.asarray(reference_forward(x, params, classes=classes))
    scale = float(np.max(np.abs(ref))) + 1e-6
    np.testing.assert_allclose(np.asarray(out), ref, rtol=5e-2, atol=5e-2 * scale)

    print("KERNEL_OK")
</pallas_src>

<mosaic_0001>
module attributes {stable_mosaic.version = 11 : i64} {
  func.func @_tgm_kernel(%arg0: i32, %arg1: memref<2x32x16xbf16, #tpu.memory_space<vmem>>, %arg2: memref<8x16x16xbf16, #tpu.memory_space<vmem>>, %arg3: memref<512x64xbf16, #tpu.memory_space<vmem>>, %arg4: memref<512x1xf32, #tpu.memory_space<vmem>>, %arg5: memref<8x512xbf16, #tpu.memory_space<vmem>>, %arg6: memref<8x1xf32, #tpu.memory_space<vmem>>, %arg7: memref<2x8x16xf32, #tpu.memory_space<vmem>>) attributes {dimension_semantics = [#tpu.dimension_semantics<parallel>], iteration_bounds = array<i64: 2>, scalar_prefetch = 0 : i64, scratch_operands = 0 : i64, tpu.core_type = #tpu.core_type<tc>, window_params = [{transform_indices = @transform_0, window_bounds = array<i64: 2, 32, 16>}, {pipeline_mode = #tpu.pipeline_mode<synchronous>, transform_indices = @transform_1, window_bounds = array<i64: 8, 16, 16>}, {pipeline_mode = #tpu.pipeline_mode<synchronous>, transform_indices = @transform_2, window_bounds = array<i64: 512, 64>}, {pipeline_mode = #tpu.pipeline_mode<synchronous>, transform_indices = @transform_3, window_bounds = array<i64: 512, 1>}, {pipeline_mode = #tpu.pipeline_mode<synchronous>, transform_indices = @transform_4, window_bounds = array<i64: 8, 512>}, {pipeline_mode = #tpu.pipeline_mode<synchronous>, transform_indices = @transform_5, window_bounds = array<i64: 8, 1>}, {transform_indices = @transform_6, window_bounds = array<i64: 2, 8, 16>}]} {
    %c0 = arith.constant 0 : index
    %c0_0 = arith.constant 0 : index
    %c0_1 = arith.constant 0 : index
    %0 = vector.load %arg1[%c0, %c0_0, %c0_1] : memref<2x32x16xbf16, #tpu.memory_space<vmem>>, vector<1x32x16xbf16>
    %1 = vector.shape_cast %0 : vector<1x32x16xbf16> to vector<32x16xbf16>
    %c0_2 = arith.constant 0 : index
    %c0_3 = arith.constant 0 : index
    %c0_4 = arith.constant 0 : index
    %2 = vector.load %arg2[%c0_2, %c0_3, %c0_4] : memref<8x16x16xbf16, #tpu.memory_space<vmem>>, vector<1x16x16xbf16>
    %3 = vector.shape_cast %2 : vector<1x16x16xbf16> to vector<16x16xbf16>
    %cst = arith.constant dense<0.000000e+00> : vector<32x16xf32>
    %4 = tpu.matmul %1, %3, %cst {dimension_numbers = #tpu.dot_dimension_numbers<[1], [0], [0], [1], [0, 0, 1, 1], [], []>} : vector<32x16xbf16>, vector<16x16xbf16>, vector<32x16xf32> -> vector<32x16xf32>
    %c1 = arith.constant 1 : index
    %c0_5 = arith.constant 0 : index
    %c0_6 = arith.constant 0 : index
    %5 = vector.load %arg2[%c1, %c0_5, %c0_6] : memref<8x16x16xbf16, #tpu.memory_space<vmem>>, vector<1x16x16xbf16>
    %6 = vector.shape_cast %5 : vector<1x16x16xbf16> to vector<16x16xbf16>
    %cst_7 = arith.constant dense<0.000000e+00> : vector<32x16xf32>
    %7 = tpu.matmul %1, %6, %cst_7 {dimension_numbers = #tpu.dot_dimension_numbers<[1], [0], [0], [1], [0, 0, 1, 1], [], []>} : vector<32x16xbf16>, vector<16x16xbf16>, vector<32x16xf32> -> vector<32x16xf32>
    %8 = arith.maximumf %4, %7 : vector<32x16xf32>
    %c2 = arith.constant 2 : index
    %c0_8 = arith.constant 0 : index
    %c0_9 = arith.constant 0 : index
    %9 = vector.load %arg2[%c2, %c0_8, %c0_9] : memref<8x16x16xbf16, #tpu.memory_space<vmem>>, vector<1x16x16xbf16>
    %10 = vector.shape_cast %9 : vector<1x16x16xbf16> to vector<16x16xbf16>
    %cst_10 = arith.constant dense<0.000000e+00> : vector<32x16xf32>
    %11 = tpu.matmul %1, %10, %cst_10 {dimension_numbers = #tpu.dot_dimension_numbers<[1], [0], [0], [1], [0, 0, 1, 1], [], []>} : vector<32x16xbf16>, vector<16x16xbf16>, vector<32x16xf32> -> vector<32x16xf32>
    %12 = arith.maximumf %8, %11 : vector<32x16xf32>
    %c3 = arith.constant 3 : index
    %c0_11 = arith.constant 0 : index
    %c0_12 = arith.constant 0 : index
    %13 = vector.load %arg2[%c3, %c0_11, %c0_12] : memref<8x16x16xbf16, #tpu.memory_space<vmem>>, vector<1x16x16xbf16>
    %14 = vector.shape_cast %13 : vector<1x16x16xbf16> to vector<16x16xbf16>
    %cst_13 = arith.constant dense<0.000000e+00> : vector<32x16xf32>
    %15 = tpu.matmul %1, %14, %cst_13 {dimension_numbers = #tpu.dot_dimension_numbers<[1], [0], [0], [1], [0, 0, 1, 1], [], []>} : vector<32x16xbf16>, vector<16x16xbf16>, vector<32x16xf32> -> vector<32x16xf32>
    %16 = arith.maximumf %12, %15 : vector<32x16xf32>
    %c4 = arith.constant 4 : index
    %c0_14 = arith.constant 0 : index
    %c0_15 = arith.constant 0 : index
    %17 = vector.load %arg2[%c4, %c0_14, %c0_15] : memref<8x16x16xbf16, #tpu.memory_space<vmem>>, vector<1x16x16xbf16>
    %18 = vector.shape_cast %17 : vector<1x16x16xbf16> to vector<16x16xbf16>
    %cst_16 = arith.constant dense<0.000000e+00> : vector<32x16xf32>
    %19 = tpu.matmul %1, %18, %cst_16 {dimension_numbers = #tpu.dot_dimension_numbers<[1], [0], [0], [1], [0, 0, 1, 1], [], []>} : vector<32x16xbf16>, vector<16x16xbf16>, vector<32x16xf32> -> vector<32x16xf32>
    %20 = arith.maximumf %16, %19 : vector<32x16xf32>
    %c5 = arith.constant 5 : index
    %c0_17 = arith.constant 0 : index
    %c0_18 = arith.constant 0 : index
    %21 = vector.load %arg2[%c5, %c0_17, %c0_18] : memref<8x16x16xbf16, #tpu.memory_space<vmem>>, vector<1x16x16xbf16>
    %22 = vector.shape_cast %21 : vector<1x16x16xbf16> to vector<16x16xbf16>
    %cst_19 = arith.constant dense<0.000000e+00> : vector<32x16xf32>
    %23 = tpu.matmul %1, %22, %cst_19 {dimension_numbers = #tpu.dot_dimension_numbers<[1], [0], [0], [1], [0, 0, 1, 1], [], []>} : vector<32x16xbf16>, vector<16x16xbf16>, vector<32x16xf32> -> vector<32x16xf32>
    %24 = arith.maximumf %20, %23 : vector<32x16xf32>
    %c6 = arith.constant 6 : index
    %c0_20 = arith.constant 0 : index
    %c0_21 = arith.constant 0 : index
    %25 = vector.load %arg2[%c6, %c0_20, %c0_21] : memref<8x16x16xbf16, #tpu.memory_space<vmem>>, vector<1x16x16xbf16>
    %26 = vector.shape_cast %25 : vector<1x16x16xbf16> to vector<16x16xbf16>
    %cst_22 = arith.constant dense<0.000000e+00> : vector<32x16xf32>
    %27 = tpu.matmul %1, %26, %cst_22 {dimension_numbers = #tpu.dot_dimension_numbers<[1], [0], [0], [1], [0, 0, 1, 1], [], []>} : vector<32x16xbf16>, vector<16x16xbf16>, vector<32x16xf32> -> vector<32x16xf32>
    %28 = arith.maximumf %24, %27 : vector<32x16xf32>
    %c7 = arith.constant 7 : index
    %c0_23 = arith.constant 0 : index
    %c0_24 = arith.constant 0 : index
    %29 = vector.load %arg2[%c7, %c0_23, %c0_24] : memref<8x16x16xbf16, #tpu.memory_space<vmem>>, vector<1x16x16xbf16>
    %30 = vector.shape_cast %29 : vector<1x16x16xbf16> to vector<16x16xbf16>
    %cst_25 = arith.constant dense<0.000000e+00> : vector<32x16xf32>
    %31 = tpu.matmul %1, %30, %cst_25 {dimension_numbers = #tpu.dot_dimension_numbers<[1], [0], [0], [1], [0, 0, 1, 1], [], []>} : vector<32x16xbf16>, vector<16x16xbf16>, vector<32x16xf32> -> vector<32x16xf32>
    %32 = arith.maximumf %28, %31 : vector<32x16xf32>
    %cst_26 = arith.constant 0.000000e+00 : bf16
    %33 = vector.broadcast %cst_26 : bf16 to vector<32x16xbf16>
    %34 = arith.maximumf %1, %33 : vector<32x16xbf16>
    %cst_27 = arith.constant 0.000000e+00 : f32
    %35 = vector.broadcast %cst_27 : f32 to vector<32x16xf32>
    %36 = arith.maximumf %32, %35 : vector<32x16xf32>
    %37 = arith.truncf %36 : vector<32x16xf32> to vector<32x16xbf16>
    %38 = tpu.concatenate %34, %37 in 0 : vector<32x16xbf16>, vector<32x16xbf16> -> vector<64x16xbf16>
    %c0_28 = arith.constant 0 : index
    %c0_29 = arith.constant 0 : index
    %39 = vector.load %arg3[%c0_28, %c0_29] : memref<512x64xbf16, #tpu.memory_space<vmem>>, vector<512x64xbf16>
    %cst_30 = arith.constant dense<0.000000e+00> : vector<512x16xf32>
    %40 = tpu.matmul %39, %38, %cst_30 {dimension_numbers = #tpu.dot_dimension_numbers<[1], [0], [0], [1], [0, 0, 1, 1], [], []>} : vector<512x64xbf16>, vector<64x16xbf16>, vector<512x16xf32> -> vector<512x16xf32>
    %c0_31 = arith.constant 0 : index
    %c0_32 = arith.constant 0 : index
    %41 = vector.load %arg4[%c0_31, %c0_32] : memref<512x1xf32, #tpu.memory_space<vmem>>, vector<512x1xf32>
    %42 = vector.broadcast %41 : vector<512x1xf32> to vector<512x16xf32>
    %43 = arith.addf %40, %42 : vector<512x16xf32>
    %cst_33 = arith.constant 0.000000e+00 : f32
    %44 = vector.broadcast %cst_33 : f32 to vector<512x16xf32>
    %45 = arith.maximumf %43, %44 : vector<512x16xf32>
    %46 = arith.truncf %45 : vector<512x16xf32> to vector<512x16xbf16>
    %c0_34 = arith.constant 0 : index
    %c0_35 = arith.constant 0 : index
    %47 = vector.load %arg5[%c0_34, %c0_35] : memref<8x512xbf16, #tpu.memory_space<vmem>>, vector<8x512xbf16>
    %cst_36 = arith.constant dense<0.000000e+00> : vector<8x16xf32>
    %48 = tpu.matmul %47, %46, %cst_36 {dimension_numbers = #tpu.dot_dimension_numbers<[1], [0], [0], [1], [0, 0, 1, 1], [], []>} : vector<8x512xbf16>, vector<512x16xbf16>, vector<8x16xf32> -> vector<8x16xf32>
    %c0_37 = arith.constant 0 : index
    %c0_38 = arith.constant 0 : index
    %49 = vector.load %arg6[%c0_37, %c0_38] : memref<8x1xf32, #tpu.memory_space<vmem>>, vector<8x1xf32>
    %50 = vector.broadcast %49 : vector<8x1xf32> to vector<8x16xf32>
    %51 = arith.addf %48, %50 : vector<8x16xf32>
    %c0_39 = arith.constant 0 : index
    %c0_40 = arith.constant 0 : index
    %c0_41 = arith.constant 0 : index
    %52 = vector.load %arg7[%c0_39, %c0_40, %c0_41] : memref<2x8x16xf32, #tpu.memory_space<vmem>>, vector<1x8x16xf32>
    %53 = vector.shape_cast %52 : vector<1x8x16xf32> to vector<8x16xf32>
    %54 = vector.shape_cast %51 : vector<8x16xf32> to vector<1x8x16xf32>
    tpu.vector_store %arg7[%c0_39, %c0_40, %c0_41], %54 {strides = array<i32>} : memref<2x8x16xf32, #tpu.memory_space<vmem>>, vector<1x8x16xf32>,
    %c1_42 = arith.constant 1 : index
    %c0_43 = arith.constant 0 : index
    %c0_44 = arith.constant 0 : index
    %55 = vector.load %arg1[%c1_42, %c0_43, %c0_44] : memref<2x32x16xbf16, #tpu.memory_space<vmem>>, vector<1x32x16xbf16>
    %56 = vector.shape_cast %55 : vector<1x32x16xbf16> to vector<32x16xbf16>
    %c0_45 = arith.constant 0 : index
    %c0_46 = arith.constant 0 : index
    %c0_47 = arith.constant 0 : index
    %57 = vector.load %arg2[%c0_45, %c0_46, %c0_47] : memref<8x16x16xbf16, #tpu.memory_space<vmem>>, vector<1x16x16xbf16>
    %58 = vector.shape_cast %57 : vector<1x16x16xbf16> to vector<16x16xbf16>
    %cst_48 = arith.constant dense<0.000000e+00> : vector<32x16xf32>
    %59 = tpu.matmul %56, %58, %cst_48 {dimension_numbers = #tpu.dot_dimension_numbers<[1], [0], [0], [1], [0, 0, 1, 1], [], []>} : vector<32x16xbf16>, vector<16x16xbf16>, vector<32x16xf32> -> vector<32x16xf32>
    %c1_49 = arith.constant 1 : index
    %c0_50 = arith.constant 0 : index
    %c0_51 = arith.constant 0 : index
    %60 = vector.load %arg2[%c1_49, %c0_50, %c0_51] : memref<8x16x16xbf16, #tpu.memory_space<vmem>>, vector<1x16x16xbf16>
    %61 = vector.shape_cast %60 : vector<1x16x16xbf16> to vector<16x16xbf16>
    %cst_52 = arith.constant dense<0.000000e+00> : vector<32x16xf32>
    %62 = tpu.matmul %56, %61, %cst_52 {dimension_numbers = #tpu.dot_dimension_numbers<[1], [0], [0], [1], [0, 0, 1, 1], [], []>} : vector<32x16xbf16>, vector<16x16xbf16>, vector<32x16xf32> -> vector<32x16xf32>
    %63 = arith.maximumf %59, %62 : vector<32x16xf32>
    %c2_53 = arith.constant 2 : index
    %c0_54 = arith.constant 0 : index
    %c0_55 = arith.constant 0 : index
    %64 = vector.load %arg2[%c2_53, %c0_54, %c0_55] : memref<8x16x16xbf16, #tpu.memory_space<vmem>>, vector<1x16x16xbf16>
    %65 = vector.shape_cast %64 : vector<1x16x16xbf16> to vector<16x16xbf16>
    %cst_56 = arith.constant dense<0.000000e+00> : vector<32x16xf32>
    %66 = tpu.matmul %56, %65, %cst_56 {dimension_numbers = #tpu.dot_dimension_numbers<[1], [0], [0], [1], [0, 0, 1, 1], [], []>} : vector<32x16xbf16>, vector<16x16xbf16>, vector<32x16xf32> -> vector<32x16xf32>
    %67 = arith.maximumf %63, %66 : vector<32x16xf32>
    %c3_57 = arith.constant 3 : index
    %c0_58 = arith.constant 0 : index
    %c0_59 = arith.constant 0 : index
    %68 = vector.load %arg2[%c3_57, %c0_58, %c0_59] : memref<8x16x16xbf16, #tpu.memory_space<vmem>>, vector<1x16x16xbf16>
    %69 = vector.shape_cast %68 : vector<1x16x16xbf16> to vector<16x16xbf16>
    %cst_60 = arith.constant dense<0.000000e+00> : vector<32x16xf32>
    %70 = tpu.matmul %56, %69, %cst_60 {dimension_numbers = #tpu.dot_dimension_numbers<[1], [0], [0], [1], [0, 0, 1, 1], [], []>} : vector<32x16xbf16>, vector<16x16xbf16>, vector<32x16xf32> -> vector<32x16xf32>
    %71 = arith.maximumf %67, %70 : vector<32x16xf32>
    %c4_61 = arith.constant 4 : index
    %c0_62 = arith.constant 0 : index
    %c0_63 = arith.constant 0 : index
    %72 = vector.load %arg2[%c4_61, %c0_62, %c0_63] : memref<8x16x16xbf16, #tpu.memory_space<vmem>>, vector<1x16x16xbf16>
    %73 = vector.shape_cast %72 : vector<1x16x16xbf16> to vector<16x16xbf16>
    %cst_64 = arith.constant dense<0.000000e+00> : vector<32x16xf32>
    %74 = tpu.matmul %56, %73, %cst_64 {dimension_numbers = #tpu.dot_dimension_numbers<[1], [0], [0], [1], [0, 0, 1, 1], [], []>} : vector<32x16xbf16>, vector<16x16xbf16>, vector<32x16xf32> -> vector<32x16xf32>
    %75 = arith.maximumf %71, %74 : vector<32x16xf32>
    %c5_65 = arith.constant 5 : index
    %c0_66 = arith.constant 0 : index
    %c0_67 = arith.constant 0 : index
    %76 = vector.load %arg2[%c5_65, %c0_66, %c0_67] : memref<8x16x16xbf16, #tpu.memory_space<vmem>>, vector<1x16x16xbf16>
    %77 = vector.shape_cast %76 : vector<1x16x16xbf16> to vector<16x16xbf16>
    %cst_68 = arith.constant dense<0.000000e+00> : vector<32x16xf32>
    %78 = tpu.matmul %56, %77, %cst_68 {dimension_numbers = #tpu.dot_dimension_numbers<[1], [0], [0], [1], [0, 0, 1, 1], [], []>} : vector<32x16xbf16>, vector<16x16xbf16>, vector<32x16xf32> -> vector<32x16xf32>
    %79 = arith.maximumf %75, %78 : vector<32x16xf32>
    %c6_69 = arith.constant 6 : index
    %c0_70 = arith.constant 0 : index
    %c0_71 = arith.constant 0 : index
    %80 = vector.load %arg2[%c6_69, %c0_70, %c0_71] : memref<8x16x16xbf16, #tpu.memory_space<vmem>>, vector<1x16x16xbf16>
    %81 = vector.shape_cast %80 : vector<1x16x16xbf16> to vector<16x16xbf16>
    %cst_72 = arith.constant dense<0.000000e+00> : vector<32x16xf32>
    %82 = tpu.matmul %56, %81, %cst_72 {dimension_numbers = #tpu.dot_dimension_numbers<[1], [0], [0], [1], [0, 0, 1, 1], [], []>} : vector<32x16xbf16>, vector<16x16xbf16>, vector<32x16xf32> -> vector<32x16xf32>
    %83 = arith.maximumf %79, %82 : vector<32x16xf32>
    %c7_73 = arith.constant 7 : index
    %c0_74 = arith.constant 0 : index
    %c0_75 = arith.constant 0 : index
    %84 = vector.load %arg2[%c7_73, %c0_74, %c0_75] : memref<8x16x16xbf16, #tpu.memory_space<vmem>>, vector<1x16x16xbf16>
    %85 = vector.shape_cast %84 : vector<1x16x16xbf16> to vector<16x16xbf16>
    %cst_76 = arith.constant dense<0.000000e+00> : vector<32x16xf32>
    %86 = tpu.matmul %56, %85, %cst_76 {dimension_numbers = #tpu.dot_dimension_numbers<[1], [0], [0], [1], [0, 0, 1, 1], [], []>} : vector<32x16xbf16>, vector<16x16xbf16>, vector<32x16xf32> -> vector<32x16xf32>
    %87 = arith.maximumf %83, %86 : vector<32x16xf32>
    %cst_77 = arith.constant 0.000000e+00 : bf16
    %88 = vector.broadcast %cst_77 : bf16 to vector<32x16xbf16>
    %89 = arith.maximumf %56, %88 : vector<32x16xbf16>
    %cst_78 = arith.constant 0.000000e+00 : f32
    %90 = vector.broadcast %cst_78 : f32 to vector<32x16xf32>
    %91 = arith.maximumf %87, %90 : vector<32x16xf32>
    %92 = arith.truncf %91 : vector<32x16xf32> to vector<32x16xbf16>
    %93 = tpu.concatenate %89, %92 in 0 : vector<32x16xbf16>, vector<32x16xbf16> -> vector<64x16xbf16>
    %c0_79 = arith.constant 0 : index
    %c0_80 = arith.constant 0 : index
    %94 = vector.load %arg3[%c0_79, %c0_80] : memref<512x64xbf16, #tpu.memory_space<vmem>>, vector<512x64xbf16>
    %cst_81 = arith.constant dense<0.000000e+00> : vector<512x16xf32>
    %95 = tpu.matmul %94, %93, %cst_81 {dimension_numbers = #tpu.dot_dimension_numbers<[1], [0], [0], [1], [0, 0, 1, 1], [], []>} : vector<512x64xbf16>, vector<64x16xbf16>, vector<512x16xf32> -> vector<512x16xf32>
    %c0_82 = arith.constant 0 : index
    %c0_83 = arith.constant 0 : index
    %96 = vector.load %arg4[%c0_82, %c0_83] : memref<512x1xf32, #tpu.memory_space<vmem>>, vector<512x1xf32>
    %97 = vector.broadcast %96 : vector<512x1xf32> to vector<512x16xf32>
    %98 = arith.addf %95, %97 : vector<512x16xf32>
    %cst_84 = arith.constant 0.000000e+00 : f32
    %99 = vector.broadcast %cst_84 : f32 to vector<512x16xf32>
    %100 = arith.maximumf %98, %99 : vector<512x16xf32>
    %101 = arith.truncf %100 : vector<512x16xf32> to vector<512x16xbf16>
    %c0_85 = arith.constant 0 : index
    %c0_86 = arith.constant 0 : index
    %102 = vector.load %arg5[%c0_85, %c0_86] : memref<8x512xbf16, #tpu.memory_space<vmem>>, vector<8x512xbf16>
    %cst_87 = arith.constant dense<0.000000e+00> : vector<8x16xf32>
    %103 = tpu.matmul %102, %101, %cst_87 {dimension_numbers = #tpu.dot_dimension_numbers<[1], [0], [0], [1], [0, 0, 1, 1], [], []>} : vector<8x512xbf16>, vector<512x16xbf16>, vector<8x16xf32> -> vector<8x16xf32>
    %c0_88 = arith.constant 0 : index
    %c0_89 = arith.constant 0 : index
    %104 = vector.load %arg6[%c0_88, %c0_89] : memref<8x1xf32, #tpu.memory_space<vmem>>, vector<8x1xf32>
    %105 = vector.broadcast %104 : vector<8x1xf32> to vector<8x16xf32>
    %106 = arith.addf %103, %105 : vector<8x16xf32>
    %c1_90 = arith.constant 1 : index
    %c0_91 = arith.constant 0 : index
    %c0_92 = arith.constant 0 : index
    %107 = vector.load %arg7[%c1_90, %c0_91, %c0_92] : memref<2x8x16xf32, #tpu.memory_space<vmem>>, vector<1x8x16xf32>
    %108 = vector.shape_cast %107 : vector<1x8x16xf32> to vector<8x16xf32>
    %109 = vector.shape_cast %106 : vector<8x16xf32> to vector<1x8x16xf32>
    tpu.vector_store %arg7[%c1_90, %c0_91, %c0_92], %109 {strides = array<i32>} : memref<2x8x16xf32, #tpu.memory_space<vmem>>, vector<1x8x16xf32>,
    return
  }
  func.func @transform_0(%arg0: i32) -> (i32, i32, i32) {
    %c0_i32 = arith.constant 0 : i32
    %c0_i32_0 = arith.constant 0 : i32
    %c0_i32_1 = arith.constant 0 : i32
    return %arg0, %c0_i32, %c0_i32_0 : i32, i32, i32
  }
  func.func @transform_1(%arg0: i32) -> (i32, i32, i32) {
    %c0_i32 = arith.constant 0 : i32
    %c0_i32_0 = arith.constant 0 : i32
    %c0_i32_1 = arith.constant 0 : i32
    %c0_i32_2 = arith.constant 0 : i32
    return %c0_i32, %c0_i32_0, %c0_i32_1 : i32, i32, i32
  }
  func.func @transform_2(%arg0: i32) -> (i32, i32) {
    %c0_i32 = arith.constant 0 : i32
    %c0_i32_0 = arith.constant 0 : i32
    %c0_i32_1 = arith.constant 0 : i32
    return %c0_i32, %c0_i32_0 : i32, i32
  }
  func.func @transform_3(%arg0: i32) -> (i32, i32) {
    %c0_i32 = arith.constant 0 : i32
    %c0_i32_0 = arith.constant 0 : i32
    %c0_i32_1 = arith.constant 0 : i32
    return %c0_i32, %c0_i32_0 : i32, i32
  }
  func.func @transform_4(%arg0: i32) -> (i32, i32) {
    %c0_i32 = arith.constant 0 : i32
    %c0_i32_0 = arith.constant 0 : i32
    %c0_i32_1 = arith.constant 0 : i32
    return %c0_i32, %c0_i32_0 : i32, i32
  }
  func.func @transform_5(%arg0: i32) -> (i32, i32) {
    %c0_i32 = arith.constant 0 : i32
    %c0_i32_0 = arith.constant 0 : i32
    %c0_i32_1 = arith.constant 0 : i32
    return %c0_i32, %c0_i32_0 : i32, i32
  }
  func.func @transform_6(%arg0: i32) -> (i32, i32, i32) {
    %c0_i32 = arith.constant 0 : i32
    %c0_i32_0 = arith.constant 0 : i32
    %c0_i32_1 = arith.constant 0 : i32
    return %arg0, %c0_i32, %c0_i32_0 : i32, i32, i32
  }
}

</mosaic_0001>

<bundles_post_ra>
// kernel: _lambda_.1
= control target key start
LH: loop header
LB: loop body
LE: loop exit
PB: predicated region body
PF: predicated region fallthrough
CT: control target
= control target key end

     0   :  { %11 = vsyncpa [#allocation3], 0  ;;  %s6138_s0 = inlined_call_operand.vmem [shape: bf16[4,32,16], index: 0, kind: input, shape index: {}]   ;;  %s6139_s1 = inlined_call_operand.vmem [shape: bf16[8,16,16], index: 1, kind: input, shape index: {}]   ;;  %s6140_s2 = inlined_call_operand.vmem [shape: bf16[512,64], index: 2, kind: input, shape index: {}]   ;;  %s6141_s3 = inlined_call_operand.vmem [shape: f32[512,1], index: 3, kind: input, shape index: {}]   ;;  %s6142_s4 = inlined_call_operand.vmem [shape: bf16[8,512], index: 4, kind: input, shape index: {}]   ;;  %s6143_s5 = inlined_call_operand.vmem [shape: f32[8,1], index: 5, kind: input, shape index: {}]   ;;  %s6144_s6 = inlined_call_operand.hbm [shape: f32[4,8,16], index: 6, kind: output, shape index: {}]  }
   0x1   :  { %13 = vsyncpa [#allocation3 + $0x1], 0  ;;  %s4713_s21 = smov 0   ;;  %s4715_s22 = smov 0  }
   0x2   :  { %s4717_s23 = smov 0   ;;  %s4719_s24 = smov 0  }
   0x3 LB: > { %s4734_s25 = sadd.s32 4294967295, %s4672_s24   ;;  %s3780_s26 = sadd.s32 4294967294, %s4672_s24   ;;  %s4672_s24 = sphi %s4719_s24, %s6203_s24   ;;  %s4668_s23 = sphi %s4717_s23, %s6202_s23   ;;  %s4664_s22 = sphi %s4715_s22, %s6201_s22   ;;  %s4660_s21 = sphi %s4713_s21, %s6200_s21  }
   0x4   : > { %s4738_s27 = sadd.s32 1, %s4672_s24   ;;  %s157_s28 = sadd.s32 1, %s4668_s23 }
   0x5   : > { %s154_s29 = ssub.s32 %s4672_s24, %s4738_s27  ;;  %p167_p0 = scmp.ne.s32.totalorder %s4668_s23, %s4664_s22 }
   0x6   : > { %p155_p1 = scmp.eq.s32.totalorder %s154_s29, 0  ;;  %p168_p2 = scmp.eq.s32.totalorder %s4734_s25, 1 }
   0x7   : > { %p173_p3 = scmp.ne.s32.totalorder %s4664_s22, %s4660_s21  ;;  %p174_p4 = scmp.eq.s32.totalorder %s3780_s26, 1 }
   0x8   : > { %s4749_s30 = scalar_select %p155_p1, %s4668_s23, %s157_s28  }
   0x9   : > { %p4751_p5 = por %p168_p2, %p167_p0  ;;  %p4755_p6 = por %p174_p4, %p173_p3 }
   0xa   : > { %p3783_p7 = scmp.ge.s32.totalorder %s4672_s24, 1  ;;  %p217_p8 = scmp.lt.s32.totalorder %s4672_s24, 3 }
   0xc   : > { %p218_p9 = pnand %p3783_p7, %p217_p8 }
   0xe   : > { %221 = sbr.rel (%p218_p9) target bundleno = 1477 (0x5c5), region = 44 }
  0x15   : > { %v4520_v0 = vld [vmem:[%s6139_s1] sm:$0xff]   ;;  %s3785_s11 = sshll.u32 %s4734_s25, 1  ;;  %v4521_v1 = vld [vmem:[%s6139_s1 + $0x8] sm:$0xff]   ;;  %v4524_v2 = vld [vmem:[%s6139_s1 + $0x10] sm:$0xff]   ;;  %v6145_v4 = vmov 0   ;;  %vm279_vm0 = vcmask 130048  }
  0x16   : > { %p249_p10 = scmp.lt.s32.totalorder %s3785_s11, 3  ;;  %4228 = vmatprep.subr.bf16.mxu0 %v4520_v0  ;;  %4234 = vmatprep.subr.bf16.mxu1 %v4521_v1  ;;  %v4525_v3 = vld [vmem:[%s6139_s1 + $0x18] sm:$0xff]   ;;  %v4526_v11 = vld [vmem:[%s6139_s1 + $0x20] sm:$0xff]   ;;  %v4527_v12 = vld [vmem:[%s6139_s1 + $0x28] sm:$0xff]   ;;  %vm1399_vm1 = vcmask 523264   ;;  %s245_s20 = sand.u32 1, %s4664_s22  }
  0x17   : > { %4229 = vmatpush3.bf16.msra.mxu0 %v4520_v0  ;;  %4235 = vmatpush3.bf16.msra.mxu1 %v4521_v1  ;;  %v4810_v13 = vld [vmem:[%s6141_s3] sm:$0xff]  ;;  %v4528_v15 = vld [vmem:[%s6139_s1 + $0x30] sm:$0xff]   ;;  %v4529_v16 = vld [vmem:[%s6139_s1 + $0x38] sm:$0xff]   ;;  %s3784_s28 = sshll.u32 %s245_s20, 4  ;;  %s4019_s9 = sshll.u32 %s4734_s25, 8 }
  0x18   : > { %s6205_s11 = smov (!%p249_p10, %s3785_s11), 3  ;;  %4240 = vmatprep.subr.bf16.mxu0 %v4524_v2  ;;  %4246 = vmatprep.subr.bf16.mxu1 %v4525_v3  ;;  %v4815_v14 = vld [vmem:[%s6141_s3 + $0x80] sm:$0xff]  ;;  %v4832_v17 = vld [vmem:[%s6141_s3 + $0x8] sm:$0xff]  ;;  %v4848_v19 = vld [vmem:[%s6141_s3 + $0x98] sm:$0xff]  ;;  %s5803_s29 = scalar_lea.vmem [#allocation2], %s3784_s28 }
  0x19   : > { %s4018_s18 = sshll.u32 %s6205_s11, 4  ;;  %4519 = vset.pattern.permute.xlu1 %v6145_v4  ;;  %4518 = vset.pattern.permute.xlu0 %v6145_v4  ;;  %v4837_v18 = vld [vmem:[%s6141_s3 + $0x88] sm:$0xff]  ;;  %v4853_v20 = vld [vmem:[%s6141_s3 + $0x90] sm:$0xff]  ;;  %v4862_v21 = vld [vmem:[%s6141_s3 + $0x18] sm:$0xff]  ;;  %s3718_s28 = sshll.u32 %s5803_s29, 4  ;;  %s6091_s28 = int_to_ptr.vmem [resolvable:$true] %s3718_s28 }
  0x1a   : > { %s4778_s26 = scalar_lea.vmem %s6138_s0, %s4018_s18  ;;  %921 = vperm.xlu1 %4519, %v4810_v13   ;;  %1001 = vperm.xlu0 %4518, %v4815_v14   ;;  %v4867_v22 = vld [vmem:[%s6141_s3 + $0x10] sm:$0xff]  ;;  %v4872_v23 = vld [vmem:[%s6141_s3 + $0xa8] sm:$0xff]  ;;  %v4877_v24 = vld [vmem:[%s6141_s3 + $0xa0] sm:$0xff]  ;;  %s6089_s11 = scalar_lea.hbm %s6144_s6, %s4019_s9 }
  0x1b   : > { %v4782_v5 = vld [vmem:[%s4778_s26] sm:$0xf]  ;;  %v4785_v6 = vld [vmem:[%s4778_s26 + $0x4] sm:$0xf]  ;;  %v4788_v7 = vld [vmem:[%s4778_s26 + $0x8] sm:$0xf] }
  0x1c   : > { %v3788_v8 = vcombine.low %v4782_v5, %v4785_v6  ;;  %v4793_v9 = vld [vmem:[%s4778_s26 + $0xc] sm:$0xf]  ;;  %v4891_v26 = vld [vmem:[%s6141_s3 + $0x20] sm:$0xff]  ;;  %v4898_v27 = vld [vmem:[%s6141_s3 + $0xb8] sm:$0xff]  ;;  %v769_v1 = vmax.bf16 %v6145_v4, %v4782_v5  ;;  %v771_v5 = vmax.bf16 %v6145_v4, %v4788_v7  ;;  %s6097_s25 = scalar_lea.sflag [#allocation3], %s245_s20  ;;  %s4610_s12 = scalar_lea.vmem %s6091_s28, 256 }
  0x1d   : > { %v3789_v10 = vcombine.low %v4788_v7, %v4793_v9  ;;  %v4886_v25 = vld [vmem:[%s6141_s3 + $0x28] sm:$0xff]  ;;  %v4903_v28 = vld [vmem:[%s6141_s3 + $0xb0] sm:$0xff]  ;;  %v4910_v29 = vld [vmem:[%s6141_s3 + $0x38] sm:$0xff]  ;;  %p4611_p11 = scmp.ne.s32.totalorder %s6091_s28, %s4610_s12  ;;  %s4675_s13 = smov [#allocation2]  }
  0x1e   : > { %4230 = vmatprep.mubr.msk.bf16.mxu0 %vm279_vm0, %v3788_v8  ;;  %4236 = vmatprep.mubr.msk.bf16.mxu1 %vm279_vm0, %v3788_v8  ;;  %v4915_v30 = vld [vmem:[%s6141_s3 + $0x30] sm:$0xff]  ;;  %v4922_v31 = vld [vmem:[%s6141_s3 + $0xc8] sm:$0xff]  ;;  %v4927_v32 = vld [vmem:[%s6141_s3 + $0xc0] sm:$0xff]  ;;  %s4614_s14 = sshll.u32 %s4675_s13, 4  ;;  %s4615_s14 = int_to_ptr.vmem [resolvable:$false] %s4614_s14 }
  0x1f   : > { %4231 = vmatmul.mubr.msk.bf16.vlgmr.msra.gmra.mrb[0].mxu0 %vm279_vm0, %v3789_v10  ;;  %4237 = vmatmul.mubr.msk.bf16.vlgmr.msra.gmra.mrb[0].mxu1 %vm279_vm0, %v3789_v10  ;;  %v4934_v33 = vld [vmem:[%s6141_s3 + $0x48] sm:$0xff]  ;;  %v4939_v34 = vld [vmem:[%s6141_s3 + $0x40] sm:$0xff]  ;;  %v4946_v35 = vld [vmem:[%s6141_s3 + $0xd8] sm:$0xff]  ;;  %p4612_p12 = pnand %p4611_p11, %p4751_p5  ;;  %s4616_s15 = scalar_lea.vmem %s4615_s14, 512 }
  0x20   : > { %4241 = vmatpush3.bf16.msra.mxu0 %v4524_v2  ;;  %4247 = vmatpush3.bf16.msra.mxu1 %v4525_v3  ;;  %v4951_v36 = vld [vmem:[%s6141_s3 + $0xd0] sm:$0xff]  ;;  %v4958_v37 = vld [vmem:[%s6141_s3 + $0x58] sm:$0xff]  ;;  %v4970_v39 = vld [vmem:[%s6141_s3 + $0xe8] sm:$0xff]  ;;  %v770_v2 = vmax.bf16 %v6145_v4, %v4785_v6  ;;  %v772_v6 = vmax.bf16 %v6145_v4, %v4793_v9  ;;  %p4617_p0 = scmp.lt.s32.totalorder %s6091_s28, %s4615_s14  ;;  %p4618_p1 = scmp.lt.s32.totalorder %s4616_s15, %s4610_s12 }
  0x21   : > { %4242 = vmatprep.mubr.msk.bf16.mxu0 %vm279_vm0, %v3788_v8  ;;  %4248 = vmatprep.mubr.msk.bf16.mxu1 %vm279_vm0, %v3788_v8  ;;  %v4963_v38 = vld [vmem:[%s6141_s3 + $0x50] sm:$0xff]  ;;  %v4975_v40 = vld [vmem:[%s6141_s3 + $0xe0] sm:$0xff]  ;;  %v4982_v41 = vld [vmem:[%s6141_s3 + $0x68] sm:$0xff]  ;;  %p4613_p13 = pneg %p4612_p12 }
  0x22   : > { %4252 = vmatprep.subr.bf16.mxu0 %v4526_v11  ;;  %4258 = vmatprep.subr.bf16.mxu1 %v4527_v12  ;;  %v4987_v42 = vld [vmem:[%s6141_s3 + $0x60] sm:$0xff]  ;;  %v4994_v43 = vld [vmem:[%s6141_s3 + $0xf8] sm:$0xff]  ;;  %v4999_v44 = vld [vmem:[%s6141_s3 + $0xf0] sm:$0xff]  ;;  %p4619_p2 = por %p4618_p1, %p4617_p0 }
  0x23   : > { %926 = vperm.xlu1 %4519, %v4832_v17   ;;  %1006 = vperm.xlu0 %4518, %v4837_v18   ;;  %v5008_v45 = vld [vmem:[%s6141_s3 + $0x78] sm:$0xff]  ;;  %v5013_v46 = vld [vmem:[%s6141_s3 + $0x70] sm:$0xff]  ;;  %v5020_v47 = vld [vmem:[%s6141_s3 + $0x188] sm:$0xff] }
  0x24   : > { %v5025_v48 = vld [vmem:[%s6141_s3 + $0x180] sm:$0xff]  ;;  %v5032_v49 = vld [vmem:[%s6141_s3 + $0x108] sm:$0xff]  ;;  %v5044_v51 = vld [vmem:[%s6141_s3 + $0x198] sm:$0xff]  ;;  %p4620_p3 = pnand %p4619_p2, %p4613_p13 }
  0x25   : > { %v5037_v50 = vld [vmem:[%s6141_s3 + $0x100] sm:$0xff]  ;;  %v5049_v52 = vld [vmem:[%s6141_s3 + $0x190] sm:$0xff]  ;;  %v5056_v53 = vld [vmem:[%s6141_s3 + $0x118] sm:$0xff] }
  0x26   : > { %v5061_v54 = vld [vmem:[%s6141_s3 + $0x110] sm:$0xff]  ;;  %v5068_v55 = vld [vmem:[%s6141_s3 + $0x1a8] sm:$0xff]  ;;  %v5073_v56 = vld [vmem:[%s6141_s3 + $0x1a0] sm:$0xff] }
  0x27   : > { %4243 = vmatmul.mubr.msk.bf16.vlgmr.msra.gmra.mrb[4].mxu0 %vm279_vm0, %v3789_v10  ;;  %4249 = vmatmul.mubr.msk.bf16.vlgmr.msra.gmra.mrb[4].mxu1 %vm279_vm0, %v3789_v10  ;;  %v5080_v57 = vld [vmem:[%s6141_s3 + $0x128] sm:$0xff]  ;;  %v5085_v58 = vld [vmem:[%s6141_s3 + $0x120] sm:$0xff]  ;;  %v5092_v59 = vld [vmem:[%s6141_s3 + $0x1b8] sm:$0xff] }
  0x28   : > { %4253 = vmatpush3.bf16.msra.mxu0 %v4526_v11  ;;  %4259 = vmatpush3.bf16.msra.mxu1 %v4527_v12  ;;  %v5097_v60 = vld [vmem:[%s6141_s3 + $0x1b0] sm:$0xff]  ;;  %v5104_v61 = vld [vmem:[%s6141_s3 + $0x138] sm:$0xff]  ;;  %v5116_v63 = vld [vmem:[%s6141_s3 + $0x1c8] sm:$0xff] }
  0x29   : > { %4254 = vmatprep.mubr.msk.bf16.mxu0 %vm279_vm0, %v3788_v8  ;;  %4260 = vmatprep.mubr.msk.bf16.mxu1 %vm279_vm0, %v3788_v8  ;;  %v5109_v62 = vld [vmem:[%s6141_s3 + $0x130] sm:$0xff]  ;;  %v5121_v0 = vld [vmem:[%s6141_s3 + $0x1c0] sm:$0xff]  ;;  %v5132_v3 = vld [vmem:[%s6141_s3 + $0x148] sm:$0xff] }
  0x2a   : > { %4264 = vmatprep.subr.bf16.mxu0 %v4528_v15  ;;  %4270 = vmatprep.subr.bf16.mxu1 %v4529_v16  ;;  %v5148_v11 = vld [vmem:[%s6141_s3 + $0x1d8] sm:$0xff]  ;;  %v5153_v12 = vld [vmem:[%s6141_s3 + $0x1d0] sm:$0xff] }
  0x2b   : > { %1016 = vperm.xlu1 %4519, %v4848_v19   ;;  %1011 = vperm.xlu0 %4518, %v4853_v20   ;;  %v5160_v7 = vld [vmem:[%s6141_s3 + $0x158] sm:$0xff]  ;;  %v5165_v9 = vld [vmem:[%s6141_s3 + $0x150] sm:$0xff] }
  0x2c   : > { %v5209_v4 = vld [vmem:[%s6141_s3 + $0x1f0] sm:$0xff] }
  0x2f   : > { %4255 = vmatmul.mubr.msk.bf16.vlgmr.msra.gmra.mrb[8].mxu0 %vm279_vm0, %v3789_v10  ;;  %4261 = vmatmul.mubr.msk.bf16.vlgmr.msra.gmra.mrb[8].mxu1 %vm279_vm0, %v3789_v10 }
  0x30   : > { %4265 = vmatpush3.bf16.msra.mxu0 %v4528_v15  ;;  %4271 = vmatpush3.bf16.msra.mxu1 %v4529_v16  ;;  %v3829_v15 = vcombine.low %v771_v5, %v772_v6  ;;  %v5172_v16 = vld [vmem:[%s6141_s3 + $0x1e8] sm:$0xff]  ;;  %v4530_v5 = vld [vmem:[%s6140_s2] sm:$0xff]   ;;  %v4531_v6 = vld [vmem:[%s6140_s2 + $0xb0] sm:$0xff]  }
  0x31   : > { %4266 = vmatprep.mubr.msk.bf16.mxu0 %vm279_vm0, %v3788_v8  ;;  %4272 = vmatprep.mubr.msk.bf16.mxu1 %vm279_vm0, %v3788_v8  ;;  %v5137_v8 = vld [vmem:[%s6141_s3 + $0x140] sm:$0xff] }
  0x32   : > { %936 = vperm.xlu1 %4519, %v4862_v21   ;;  %931 = vperm.xlu0 %4518, %v4867_v22  }
  0x36   : > { %1026 = vperm.xlu1 %4519, %v4872_v23   ;;  %1021 = vperm.xlu0 %4518, %v4877_v24  }
  0x37   : > { %4267 = vmatmul.mubr.msk.bf16.vlgmr.msra.gmra.mrb[12].mxu0 %vm279_vm0, %v3789_v10  ;;  %4273 = vmatmul.mubr.msk.bf16.vlgmr.msra.gmra.mrb[12].mxu1 %vm279_vm0, %v3789_v10  ;;  %v3828_v10 = vcombine.low %v769_v1, %v770_v2  ;;  %v5177_v1 = vld [vmem:[%s6141_s3 + $0x1e0] sm:$0xff]  ;;  %v5184_v2 = vld [vmem:[%s6141_s3 + $0x168] sm:$0xff] }
  0x38   : > { %4284 = vmatprep.mubr.msk.bf16.mxu0 %vm1399_vm1, %v4530_v5  ;;  %4328 = vmatprep.mubr.msk.bf16.mxu1 %vm1399_vm1, %v4531_v6  ;;  %v5216_v5 = vld [vmem:[%s6141_s3 + $0x178] sm:$0xff]  ;;  %v5221_v6 = vld [vmem:[%s6141_s3 + $0x170] sm:$0xff] }
  0x39   : > { %4276 = vmatprep.subr.bf16.mxu0 %v3828_v10  ;;  %4468 = vmatprep.subr.bf16.mxu1 %v3828_v10 }
  0x3a   : > { %946 = vperm.xlu1 %4519, %v4886_v25   ;;  %941 = vperm.xlu0 %4518, %v4891_v26  }
  0x3b   : > { %4277 = vmatpush3.bf16.msra.mxu0 %v3828_v10  ;;  %4472 = vmatpush3.bf16.msra.mxu1 %v3828_v10  ;;  %v5189_v10 = vld [vmem:[%s6141_s3 + $0x160] sm:$0xff] }
  0x3c   : > { %4278 = vmatprep.subr.bf16.mxu0 %v3829_v15  ;;  %4469 = vmatprep.subr.bf16.mxu1 %v3829_v15 }
  0x3e   : > { %1036 = vperm.xlu1 %4519, %v4898_v27   ;;  %1031 = vperm.xlu0 %4518, %v4903_v28  }
  0x3f   : > { %4279 = vmatpush3.bf16.msra.mxu0 %v3829_v15  ;;  %4473 = vmatpush3.bf16.msra.mxu1 %v3829_v15  ;;  %v5204_v15 = vld [vmem:[%s6141_s3 + $0x1f8] sm:$0xff] }
  0x42   : > { %956 = vperm.xlu1 %4519, %v4910_v29   ;;  %951 = vperm.xlu0 %4518, %v4915_v30  }
  0x46   : > { %1046 = vperm.xlu1 %4519, %v4922_v31   ;;  %1041 = vperm.xlu0 %4518, %v4927_v32  }
  0x4a   : > { %966 = vperm.xlu1 %4519, %v4934_v33   ;;  %961 = vperm.xlu0 %4518, %v4939_v34  }
  0x4e   : > { %1056 = vperm.xlu1 %4519, %v4946_v35   ;;  %1051 = vperm.xlu0 %4518, %v4951_v36  }
  0x52   : > { %976 = vperm.xlu1 %4519, %v4958_v37   ;;  %971 = vperm.xlu0 %4518, %v4963_v38  }
  0x56   : > { %1066 = vperm.xlu1 %4519, %v4970_v39   ;;  %1061 = vperm.xlu0 %4518, %v4975_v40  }
  0x5a   : > { %986 = vperm.xlu1 %4519, %v4982_v41   ;;  %981 = vperm.xlu0 %4518, %v4987_v42  }
  0x5e   : > { %1076 = vperm.xlu1 %4519, %v4994_v43   ;;  %1071 = vperm.xlu0 %4518, %v4999_v44  }
  0x62   : > { %996 = vperm.xlu1 %4519, %v5008_v45   ;;  %991 = vperm.xlu0 %4518, %v5013_v46  }
  0x66   : > { %1166 = vperm.xlu1 %4519, %v5020_v47   ;;  %1161 = vperm.xlu0 %4518, %v5025_v48  }
  0x6a   : > { %1086 = vperm.xlu1 %4519, %v5032_v49   ;;  %1081 = vperm.xlu0 %4518, %v5037_v50  }
  0x6e   : > { %1176 = vperm.xlu1 %4519, %v5044_v51   ;;  %1171 = vperm.xlu0 %4518, %v5049_v52  }
  0x72   : > { %1096 = vperm.xlu1 %4519, %v5056_v53   ;;  %1091 = vperm.xlu0 %4518, %v5061_v54  }
  0x76   : > { %1186 = vperm.xlu1 %4519, %v5068_v55   ;;  %1181 = vperm.xlu0 %4518, %v5073_v56  }
  0x7a   : > { %1106 = vperm.xlu1 %4519, %v5080_v57   ;;  %1101 = vperm.xlu0 %4518, %v5085_v58  }
  0x7e   : > { %1196 = vperm.xlu1 %4519, %v5092_v59   ;;  %1191 = vperm.xlu0 %4518, %v5097_v60  }
  0x82   : > { %1116 = vperm.xlu1 %4519, %v5104_v61   ;;  %1111 = vperm.xlu0 %4518, %v5109_v62  }
  0x86   : > { %1206 = vperm.xlu1 %4519, %v5116_v63   ;;  %1201 = vperm.xlu0 %4518, %v5121_v0  }
  0x8a   : > { %1126 = vperm.xlu1 %4519, %v5132_v3   ;;  %1121 = vperm.xlu0 %4518, %v5137_v8  }
  0x8e   : > { %1216 = vperm.xlu1 %4519, %v5148_v11   ;;  %1211 = vperm.xlu0 %4518, %v5153_v12  }
  0x92   : > { %1136 = vperm.xlu1 %4519, %v5160_v7   ;;  %1131 = vperm.xlu0 %4518, %v5165_v9  }
  0x96   : > { %1226 = vperm.xlu1 %4519, %v5172_v16   ;;  %1221 = vperm.xlu0 %4518, %v5177_v1  }
  0x9a   : > { %1146 = vperm.xlu1 %4519, %v5184_v2   ;;  %1141 = vperm.xlu0 %4518, %v5189_v10  }
  0x9e   : > { %1236 = vperm.xlu1 %4519, %v5204_v15   ;;  %1231 = vperm.xlu0 %4518, %v5209_v4  }
  0xa2   : > { %1156 = vperm.xlu1 %4519, %v5216_v5   ;;  %1151 = vperm.xlu0 %4518, %v5221_v6  }
  0xa6   : > { %2726 = vperm.xlu1 %4519, %v4837_v18   ;;  %2721 = vperm.xlu0 %4518, %v4815_v14   ;;  %v5245_v14 = vpop.permute.xlu0 %1001 }
  0xaa   : > { %2646 = vperm.xlu1 %4519, %v4832_v17   ;;  %2641 = vperm.xlu0 %4518, %v4810_v13   ;;  %v5243_v13 = vpop.permute.xlu1 %921  ;;  %v5253_v18 = vpop.permute.xlu0 %1006 }
  0xae   : > { %2736 = vperm.xlu1 %4519, %v4848_v19   ;;  %2731 = vperm.xlu0 %4518, %v4853_v20   ;;  %v5251_v17 = vpop.permute.xlu1 %926  ;;  %v5259_v20 = vpop.permute.xlu0 %1011 }
  0xb2   : > { %2656 = vperm.xlu1 %4519, %v4862_v21   ;;  %2651 = vperm.xlu0 %4518, %v4867_v22   ;;  %v5257_v19 = vpop.permute.xlu1 %1016  ;;  %v5267_v22 = vpop.permute.xlu0 %931 }
  0xb6   : > { %2746 = vperm.xlu1 %4519, %v4872_v23   ;;  %2741 = vperm.xlu0 %4518, %v4877_v24   ;;  %v5265_v21 = vpop.permute.xlu1 %936  ;;  %v5273_v24 = vpop.permute.xlu0 %1021 }
  0xba   : > { %2666 = vperm.xlu1 %4519, %v4886_v25   ;;  %2661 = vperm.xlu0 %4518, %v4891_v26   ;;  %v5271_v23 = vpop.permute.xlu1 %1026  ;;  %v5281_v26 = vpop.permute.xlu0 %941 }
  0xbe   : > { %2756 = vperm.xlu1 %4519, %v4898_v27   ;;  %2751 = vperm.xlu0 %4518, %v4903_v28   ;;  %v5279_v25 = vpop.permute.xlu1 %946  ;;  %v5287_v28 = vpop.permute.xlu0 %1031 }
  0xc2   : > { %2676 = vperm.xlu1 %4519, %v4910_v29   ;;  %2671 = vperm.xlu0 %4518, %v4915_v30   ;;  %v5285_v27 = vpop.permute.xlu1 %1036 }
  0xc6   : > { %2766 = vperm.xlu1 %4519, %v4922_v31   ;;  %2761 = vperm.xlu0 %4518, %v4927_v32  }
  0xca   : > { %2686 = vperm.xlu1 %4519, %v4934_v33   ;;  %2681 = vperm.xlu0 %4518, %v4939_v34  }
  0xce   : > { %2776 = vperm.xlu1 %4519, %v4946_v35   ;;  %2771 = vperm.xlu0 %4518, %v4951_v36  }
  0xd2   : > { %2696 = vperm.xlu1 %4519, %v4958_v37   ;;  %2691 = vperm.xlu0 %4518, %v4963_v38  }
  0xd6   : > { %2786 = vperm.xlu1 %4519, %v4970_v39   ;;  %2781 = vperm.xlu0 %4518, %v4975_v40  }
  0xda   : > { %2706 = vperm.xlu1 %4519, %v4982_v41   ;;  %2701 = vperm.xlu0 %4518, %v4987_v42   ;;  %v5293_v41 = vpop.permute.xlu1 %956  ;;  %v5295_v42 = vpop.permute.xlu0 %951 }
  0xde   : > { %2796 = vperm.xlu1 %4519, %v4994_v43   ;;  %2791 = vperm.xlu0 %4518, %v4999_v44  }
  0xe2   : > { %2716 = vperm.xlu1 %4519, %v5008_v45   ;;  %2711 = vperm.xlu0 %4518, %v5013_v46  }
  0xe6   : > { %2886 = vperm.xlu1 %4519, %v5020_v47   ;;  %2881 = vperm.xlu0 %4518, %v5025_v48  }
  0xea   : > { %2806 = vperm.xlu1 %4519, %v5032_v49   ;;  %2801 = vperm.xlu0 %4518, %v5037_v50  }
  0xee   : > { %2896 = vperm.xlu1 %4519, %v5044_v51   ;;  %2891 = vperm.xlu0 %4518, %v5049_v52  }
  0xf2   : > { %v4232_v29 = vpop.f32.mrb[0].mxu0  ;;  %v4238_v30 = vpop.f32.mrb[0].mxu1  ;;  %2816 = vperm.xlu1 %4519, %v5056_v53   ;;  %2811 = vperm.xlu0 %4518, %v5061_v54  }
  0xf3   : > { %v395_v31 = vmax.f32 %v4232_v29, %v4238_v30  ;;  %v320_v32 = vpop.f32.mrb[1].mxu0  ;;  %v378_v33 = vpop.f32.mrb[1].mxu1 }
  0xf4   : > { %v393_v34 = vmax.f32 %v320_v32, %v378_v33  ;;  %v4233_v35 = vpop.f32.mrb[2].mxu0  ;;  %v4239_v36 = vpop.f32.mrb[2].mxu1 }
  0xf5   : > { %v396_v37 = vmax.f32 %v4233_v35, %v4239_v36  ;;  %v323_v38 = vpop.f32.mrb[3].mxu0  ;;  %v381_v39 = vpop.f32.mrb[3].mxu1 }
  0xf6   : > { %v394_v40 = vmax.f32 %v323_v38, %v381_v39  ;;  %2906 = vperm.xlu1 %4519, %v5068_v55   ;;  %2901 = vperm.xlu0 %4518, %v5073_v56   ;;  %v5301_v33 = vpop.permute.xlu1 %1046  ;;  %v5303_v56 = vpop.permute.xlu0 %1041 }
  0xf7   : > { %6151 = vst [vmem:[#allocation5_spill] sm:$0xff] %v5301_v33  ;;  %6152 = vst [vmem:[#allocation6_spill] sm:$0xff] %v5303_v56 }
  0xfa   : > { %v4244_v43 = vpop.f32.mrb[4].mxu0  ;;  %v4250_v44 = vpop.f32.mrb[4].mxu1  ;;  %2826 = vperm.xlu1 %4519, %v5080_v57   ;;  %2821 = vperm.xlu0 %4518, %v5085_v58  }
  0xfb   : > { %v457_v45 = vmax.f32 %v395_v31, %v4244_v43  ;;  %v440_v46 = vpop.f32.mrb[5].mxu0  ;;  %v502_v47 = vpop.f32.mrb[5].mxu1 }
  0xfc   : > { %v455_v48 = vmax.f32 %v393_v34, %v440_v46  ;;  %v4245_v49 = vpop.f32.mrb[6].mxu0  ;;  %v4251_v50 = vpop.f32.mrb[6].mxu1 }
  0xfd   : > { %v519_v51 = vmax.f32 %v457_v45, %v4250_v44  ;;  %v458_v52 = vmax.f32 %v396_v37, %v4245_v49  ;;  %v443_v53 = vpop.f32.mrb[7].mxu0  ;;  %v505_v54 = vpop.f32.mrb[7].mxu1 }
  0xfe   : > { %v517_v29 = vmax.f32 %v455_v48, %v502_v47  ;;  %v456_v30 = vmax.f32 %v394_v40, %v443_v53  ;;  %2916 = vperm.xlu1 %4519, %v5092_v59   ;;  %2911 = vperm.xlu0 %4518, %v5097_v60   ;;  %v5309_v48 = vpop.permute.xlu1 %966  ;;  %v5311_v60 = vpop.permute.xlu0 %961 }
  0xff   : > { %v520_v32 = vmax.f32 %v458_v52, %v4251_v50 }
 0x100   : > { %v518_v55 = vmax.f32 %v456_v30, %v505_v54 }
 0x102   : > { %v4256_v31 = vpop.f32.mrb[8].mxu0  ;;  %v4262_v34 = vpop.f32.mrb[8].mxu1  ;;  %2836 = vperm.xlu1 %4519, %v5104_v61   ;;  %2831 = vperm.xlu0 %4518, %v5109_v62  }
 0x103   : > { %v581_v35 = vmax.f32 %v519_v51, %v4256_v31  ;;  %v564_v36 = vpop.f32.mrb[9].mxu0  ;;  %v626_v37 = vpop.f32.mrb[9].mxu1 }
 0x104   : > { %v579_v38 = vmax.f32 %v517_v29, %v564_v36  ;;  %v4257_v39 = vpop.f32.mrb[10].mxu0  ;;  %v4263_v57 = vpop.f32.mrb[10].mxu1 }
 0x105   : > { %v643_v40 = vmax.f32 %v581_v35, %v4262_v34  ;;  %v582_v58 = vmax.f32 %v520_v32, %v4257_v39  ;;  %v567_v43 = vpop.f32.mrb[11].mxu0  ;;  %v629_v44 = vpop.f32.mrb[11].mxu1 }
 0x106   : > { %v641_v45 = vmax.f32 %v579_v38, %v626_v37  ;;  %v580_v46 = vmax.f32 %v518_v55, %v567_v43  ;;  %2926 = vperm.xlu1 %4519, %v5116_v63   ;;  %2921 = vperm.xlu0 %4518, %v5121_v0   ;;  %v5317_v35 = vpop.permute.xlu1 %1056  ;;  %v5319_v63 = vpop.permute.xlu0 %1051 }
 0x107   : > { %v644_v47 = vmax.f32 %v582_v58, %v4263_v57  ;;  %6153 = vst [vmem:[#allocation7_spill] sm:$0xff] %v5317_v35  ;;  %6154 = vst [vmem:[#allocation8_spill] sm:$0xff] %v5319_v63 }
 0x108   : > { %v642_v59 = vmax.f32 %v580_v46, %v629_v44 }
 0x10a   : > { %v4268_v49 = vpop.f32.mrb[12].mxu0  ;;  %v4274_v50 = vpop.f32.mrb[12].mxu1  ;;  %2846 = vperm.xlu1 %4519, %v5132_v3   ;;  %2841 = vperm.xlu0 %4518, %v5137_v8   ;;  %v4532_v8 = vld [vmem:[%s6140_s2 + $0x8] sm:$0xff]  }
 0x10b   : > { %v705_v51 = vmax.f32 %v643_v40, %v4268_v49  ;;  %v688_v52 = vpop.f32.mrb[13].mxu0  ;;  %v750_v53 = vpop.f32.mrb[13].mxu1  ;;  %v3602_v49 = vld [vmem:[%s6143_s5] sm:$0xff] }
 0x10c   : > { %v703_v54 = vmax.f32 %v641_v45, %v688_v52  ;;  %v4269_v29 = vpop.f32.mrb[14].mxu0  ;;  %v4275_v61 = vpop.f32.mrb[14].mxu1  ;;  %v4544_v52 = vld [vmem:[%s6140_s2 + $0x38] sm:$0xff]  }
 0x10d   : > { %v767_v30 = vmax.f32 %v705_v51, %v4274_v50  ;;  %v706_v62 = vmax.f32 %v644_v47, %v4269_v29  ;;  %v691_v32 = vpop.f32.mrb[15].mxu0  ;;  %v753_v55 = vpop.f32.mrb[15].mxu1  ;;  %v4538_v47 = vld [vmem:[%s6140_s2 + $0x20] sm:$0xff]   ;;  %v4542_v50 = vld [vmem:[%s6140_s2 + $0x30] sm:$0xff]  }
 0x10e   : > { %v765_v31 = vmax.f32 %v703_v54, %v750_v53  ;;  %v704_v34 = vmax.f32 %v642_v59, %v691_v32  ;;  %2936 = vperm.xlu1 %4519, %v5148_v11   ;;  %2931 = vperm.xlu0 %4518, %v5153_v12   ;;  %v5323_v43 = vpop.permute.xlu1 %976  ;;  %v5325_v3 = vpop.permute.xlu0 %971  ;;  %v4533_v11 = vld [vmem:[%s6140_s2 + $0xb8] sm:$0xff]   ;;  %v4539_v59 = vld [vmem:[%s6140_s2 + $0xd0] sm:$0xff]   ;;  %v4545_v53 = vld [vmem:[%s6140_s2 + $0xe8] sm:$0xff]  }
 0x10f   : > { %v768_v0 = vmax.f32 %v706_v62, %v4275_v61  ;;  %v775_v37 = vmax.f32 %v767_v30, 0.0  ;;  %v4546_v54 = vld [vmem:[%s6140_s2 + $0x40] sm:$0xff]   ;;  %v4547_v29 = vld [vmem:[%s6140_s2 + $0xf0] sm:$0xff]   ;;  %v4548_v61 = vld [vmem:[%s6140_s2 + $0x48] sm:$0xff]  }
 0x110   : > { %v766_v36 = vmax.f32 %v704_v34, %v753_v55  ;;  %v773_v39 = vmax.f32 %v765_v31, 0.0  ;;  %v4549_v30 = vld [vmem:[%s6140_s2 + $0xf8] sm:$0xff]   ;;  %v4550_v62 = vld [vmem:[%s6140_s2 + $0x50] sm:$0xff]   ;;  %v4552_v55 = vld [vmem:[%s6140_s2 + $0x60] sm:$0xff]  }
 0x111   : > { %v776_v38 = vmax.f32 %v768_v0, 0.0  ;;  %v4551_v32 = vld [vmem:[%s6140_s2 + $0x58] sm:$0xff]   ;;  %v4553_v31 = vld [vmem:[%s6140_s2 + $0x68] sm:$0xff]   ;;  %v4554_v34 = vld [vmem:[%s6140_s2 + $0x70] sm:$0xff]  }
 0x112   : > { %v774_v57 = vmax.f32 %v766_v36, 0.0  ;;  %2856 = vperm.xlu1 %4519, %v5160_v7   ;;  %2851 = vperm.xlu0 %4518, %v5165_v9   ;;  %v5335_v12 = vpop.permute.xlu1 %1066  ;;  %v5337_v44 = vpop.permute.xlu0 %1061  ;;  %v4534_v7 = vld [vmem:[%s6140_s2 + $0x10] sm:$0xff]   ;;  %v4535_v9 = vld [vmem:[%s6140_s2 + $0xc0] sm:$0xff]   ;;  %v4555_v0 = vld [vmem:[%s6140_s2 + $0x78] sm:$0xff]  }
 0x113   : > { %v778_v40 = vpack.c.bf16 %v776_v38, %v775_v37  ;;  %6155 = vst [vmem:[#allocation9_spill] sm:$0xff] %v5335_v12  ;;  %6156 = vst [vmem:[#allocation10_spill] sm:$0xff] %v5337_v44  ;;  %v4556_v36 = vld [vmem:[%s6140_s2 + $0x80] sm:$0xff]   ;;  %v4557_v37 = vld [vmem:[%s6140_s2 + $0x88] sm:$0xff]  }
 0x114   : > { %v777_v58 = vpack.c.bf16 %v774_v57, %v773_v39  ;;  %v4558_v38 = vld [vmem:[%s6140_s2 + $0x90] sm:$0xff]   ;;  %v4559_v39 = vld [vmem:[%s6140_s2 + $0x98] sm:$0xff]   ;;  %v4560_v57 = vld [vmem:[%s6140_s2 + $0xa0] sm:$0xff]  }
 0x116   : > { %4280 = vmatprep.subr.bf16.mxu0 %v777_v58  ;;  %4470 = vmatprep.subr.bf16.mxu1 %v777_v58  ;;  %v5351_v45 = vpop.permute.xlu1 %986  ;;  %v5353_v46 = vpop.permute.xlu0 %981 }
 0x117   : > { %4281 = vmatpush3.bf16.msra.mxu0 %v777_v58  ;;  %4474 = vmatpush3.bf16.msra.mxu1 %v777_v58 }
 0x118   : > { %4282 = vmatprep.subr.bf16.mxu0 %v778_v40  ;;  %4471 = vmatprep.subr.bf16.mxu1 %v778_v40 }
 0x119   : > { %2946 = vperm.xlu1 %4519, %v5172_v16   ;;  %2941 = vperm.xlu0 %4518, %v5177_v1   ;;  %v4536_v16 = vld [vmem:[%s6140_s2 + $0x18] sm:$0xff]   ;;  %v4537_v1 = vld [vmem:[%s6140_s2 + $0xc8] sm:$0xff]  }
 0x11b   : > { %4283 = vmatpush3.bf16.msra.mxu0 %v778_v40  ;;  %4475 = vmatpush3.bf16.msra.mxu1 %v778_v40  ;;  %v4561_v40 = vld [vmem:[%s6140_s2 + $0xa8] sm:$0xff]  }
 0x11d   : > { %2866 = vperm.xlu1 %4519, %v5184_v2   ;;  %2861 = vperm.xlu0 %4518, %v5189_v10   ;;  %v5373_v2 = vpop.permute.xlu1 %1076  ;;  %v5375_v10 = vpop.permute.xlu0 %1071 }
 0x11e   : > { %4285 = vmatmul.mubr.msk.bf16.vlgmr.msra.gmra.mrb[16].mxu0 %vm1399_vm1, %v4532_v8  ;;  %4329 = vmatmul.mubr.msk.bf16.vlgmr.msra.gmra.mrb[16].mxu1 %vm1399_vm1, %v4533_v11  ;;  %6157 = vst [vmem:[#allocation11_spill] sm:$0xff] %v5373_v2  ;;  %6158 = vst [vmem:[#allocation12_spill] sm:$0xff] %v5375_v10 }
 0x11f   : > { %4288 = vmatprep.mubr.msk.bf16.mxu0 %vm1399_vm1, %v4534_v7  ;;  %4332 = vmatprep.mubr.msk.bf16.mxu1 %vm1399_vm1, %v4535_v9 }
 0x121   : > { %2956 = vperm.xlu1 %4519, %v5204_v15   ;;  %2951 = vperm.xlu0 %4518, %v5209_v4   ;;  %v4540_v4 = vld [vmem:[%s6140_s2 + $0x28] sm:$0xff]   ;;  %v4541_v15 = vld [vmem:[%s6140_s2 + $0xd8] sm:$0xff]   ;;  %v5398_v51 = vpop.permute.xlu0 %991 }
 0x125   : > { %2876 = vperm.xlu1 %4519, %v5216_v5   ;;  %2871 = vperm.xlu0 %4518, %v5221_v6   ;;  %v4543_v5 = vld [vmem:[%s6140_s2 + $0xe0] sm:$0xff]   ;;  %v5396_v6 = vpop.permute.xlu1 %996  ;;  %v5478_v8 = vpop.permute.xlu0 %1161 }
 0x126   : > { %4289 = vmatmul.mubr.msk.bf16.gmra.mrb[20].mxu0 %vm1399_vm1, %v4536_v16  ;;  %4333 = vmatmul.mubr.msk.bf16.gmra.mrb[20].mxu1 %vm1399_vm1, %v4537_v1 }
 0x127   : > { %4292 = vmatprep.mubr.msk.bf16.mxu0 %vm1399_vm1, %v4538_v47  ;;  %4336 = vmatprep.mubr.msk.bf16.mxu1 %vm1399_vm1, %v4539_v59 }
 0x129   : > { %3605 = vperm.xlu1 %4519, %v3602_v49   ;;  %1886 = vperm.xlu0 %4518, %v3602_v49   ;;  %v5476_v58 = vpop.permute.xlu1 %1166  ;;  %v5482_v7 = vpop.permute.xlu0 %1081 }
 0x12a   : > { %6160 = vst [vmem:[#allocation14_spill] sm:$0xff] %v5482_v7 }
 0x12d   : > { %v5480_v11 = vpop.permute.xlu1 %1086  ;;  %v1172_v16 = vpop.permute.xlu0 %1171 }
 0x12e   : > { %4293 = vmatmul.mubr.msk.bf16.gmra.mrb[24].mxu0 %vm1399_vm1, %v4540_v4  ;;  %4337 = vmatmul.mubr.msk.bf16.gmra.mrb[24].mxu1 %vm1399_vm1, %v4541_v15  ;;  %6159 = vst [vmem:[#allocation13_spill] sm:$0xff] %v5480_v11 }
 0x12f   : > { %4296 = vmatprep.mubr.msk.bf16.mxu0 %vm1399_vm1, %v4542_v50  ;;  %4340 = vmatprep.mubr.msk.bf16.mxu1 %vm1399_vm1, %v4543_v5  ;;  %v5501_v50 = vld [vmem:[%s6142_s4] sm:$0xff] }
 0x130   : > { %6165 = vst [vmem:[#allocation19_spill] sm:$0xff] %v5501_v50  ;;  %v5505_v5 = vcombine.high %v5501_v50, %v5501_v50 }
 0x131   : > { %v5484_v9 = vpop.permute.xlu1 %1176  ;;  %v5488_v47 = vpop.permute.xlu0 %1091 }
 0x132   : > { %6162 = vst [vmem:[#allocation16_spill] sm:$0xff] %v5488_v47  ;;  %6166 = vst [vmem:[#allocation20_spill] sm:$0xff] %v5505_v5 }
 0x135   : > { %v5486_v1 = vpop.permute.xlu1 %1096  ;;  %v5492_v4 = vpop.permute.xlu0 %1181 }
 0x136   : > { %4297 = vmatmul.mubr.msk.bf16.gmra.mrb[28].mxu0 %vm1399_vm1, %v4544_v52  ;;  %4341 = vmatmul.mubr.msk.bf16.gmra.mrb[28].mxu1 %vm1399_vm1, %v4545_v53  ;;  %6161 = vst [vmem:[#allocation15_spill] sm:$0xff] %v5486_v1 }
 0x137   : > { %4300 = vmatprep.mubr.msk.bf16.mxu0 %vm1399_vm1, %v4546_v54  ;;  %4344 = vmatprep.mubr.msk.bf16.mxu1 %vm1399_vm1, %v4547_v29 }
 0x139   : > { %v5490_v59 = vpop.permute.xlu1 %1186  ;;  %v5496_v49 = vpop.permute.xlu0 %1101 }
 0x13a   : > { %6164 = vst [vmem:[#allocation18_spill] sm:$0xff] %v5496_v49 }
 0x13d   : > { %v5494_v15 = vpop.permute.xlu1 %1106  ;;  %v5509_v53 = vpop.permute.xlu0 %1191 }
 0x13e   : > { %4301 = vmatmul.mubr.msk.bf16.gmra.mrb[32].mxu0 %vm1399_vm1, %v4548_v61  ;;  %4345 = vmatmul.mubr.msk.bf16.gmra.mrb[32].mxu1 %vm1399_vm1, %v4549_v30  ;;  %6163 = vst [vmem:[#allocation17_spill] sm:$0xff] %v5494_v15 }
 0x13f   : > { %4304 = vmatprep.mubr.msk.bf16.mxu0 %vm1399_vm1, %v4550_v62  ;;  %1935 = vmatprep.mubr.bf16.mxu1 %v5505_v5 }
 0x141   : > { %v5507_v52 = vpop.permute.xlu1 %1196  ;;  %v5514_v29 = vpop.permute.xlu0 %1111 }
 0x142   : > { %6168 = vst [vmem:[#allocation22_spill] sm:$0xff] %v5514_v29 }
 0x145   : > { %v5512_v54 = vpop.permute.xlu1 %1116  ;;  %v5518_v30 = vpop.permute.xlu0 %1201 }
 0x146   : > { %4305 = vmatmul.mubr.msk.bf16.gmra.mrb[36].mxu0 %vm1399_vm1, %v4551_v32  ;;  %6167 = vst [vmem:[#allocation21_spill] sm:$0xff] %v5512_v54 }
 0x147   : > { %4308 = vmatprep.mubr.msk.bf16.mxu0 %vm1399_vm1, %v4552_v55 }
 0x149   : > { %v5516_v61 = vpop.permute.xlu1 %1206  ;;  %v5522_v32 = vpop.permute.xlu0 %1121 }
 0x14a   : > { %6170 = vst [vmem:[#allocation24_spill] sm:$0xff] %v5522_v32 }
 0x14d   : > { %v5520_v62 = vpop.permute.xlu1 %1126 }
 0x14e   : > { %4309 = vmatmul.mubr.msk.bf16.gmra.mrb[40].mxu0 %vm1399_vm1, %v4553_v31  ;;  %6169 = vst [vmem:[#allocation23_spill] sm:$0xff] %v5520_v62  ;;  %v5526_v31 = vpop.permute.xlu0 %1211 }
 0x14f   : > { %4312 = vmatprep.mubr.msk.bf16.mxu0 %vm1399_vm1, %v4554_v34 }
 0x151   : > { %v5524_v55 = vpop.permute.xlu1 %1216 }
 0x155   : > { %v5528_v34 = vpop.permute.xlu1 %1136 }
 0x156   : > { %4313 = vmatmul.mubr.msk.bf16.gmra.mrb[44].mxu0 %vm1399_vm1, %v4555_v0  ;;  %6171 = vst [vmem:[#allocation25_spill] sm:$0xff] %v5528_v34  ;;  %v5530_v0 = vpop.permute.xlu0 %1131 }
 0x157   : > { %4316 = vmatprep.mubr.msk.bf16.mxu0 %vm1399_vm1, %v4556_v36  ;;  %6172 = vst [vmem:[#allocation26_spill] sm:$0xff] %v5530_v0 }
 0x159   : > { %v5532_v36 = vpop.permute.xlu1 %1226 }
 0x15e   : > { %4317 = vmatmul.mubr.msk.bf16.gmra.mrb[48].mxu0 %vm1399_vm1, %v4557_v37  ;;  %v5534_v37 = vpop.permute.xlu0 %1221 }
 0x15f   : > { %4320 = vmatprep.mubr.msk.bf16.mxu0 %vm1399_vm1, %v4558_v38  ;;  %v1147_v38 = vpop.permute.xlu1 %1146 }
 0x166   : > { %4321 = vmatmul.mubr.msk.bf16.gmra.mrb[52].mxu0 %vm1399_vm1, %v4559_v39  ;;  %v1142_v39 = vpop.permute.xlu0 %1141 }
 0x167   : > { %4324 = vmatprep.mubr.msk.bf16.mxu0 %vm1399_vm1, %v4560_v57  ;;  %v5536_v57 = vpop.permute.xlu1 %1236 }
 0x16b   : > { %v1157_v5 = vpop.permute.xlu1 %1156 }
 0x16e   : > { %4325 = vmatmul.mubr.msk.bf16.gmra.mrb[56].mxu0 %vm1399_vm1, %v4561_v40  ;;  %v5538_v40 = vpop.permute.xlu0 %1231 }
 0x172   : > { %v1152_v62 = vpop.permute.xlu0 %1151 }
 0x1f1   : > { %v4286_v32 = vpop.f32.mrb[16].mxu0  ;;  %v4330_v15 = vpop.f32.mrb[16].mxu1 }
 0x1f2   : > { %v1539_v54 = vadd.f32 %v4286_v32, %v5267_v22  ;;  %v1715_v49 = vadd.f32 %v4330_v15, %v1152_v62  ;;  %v1530_v34 = vpop.f32.mrb[17].mxu0  ;;  %v1706_v29 = vpop.f32.mrb[17].mxu1 }
 0x1f3   : > { %v1531_v0 = vadd.f32 %v1530_v34, %v5243_v13  ;;  %v1707_v50 = vadd.f32 %v1706_v29, %v1142_v39  ;;  %v4287_v11 = vpop.f32.mrb[18].mxu0  ;;  %v4331_v1 = vpop.f32.mrb[18].mxu1 }
 0x1f4   : > { %v1542_v7 = vadd.f32 %v4287_v11, %v5265_v21  ;;  %v1718_v47 = vadd.f32 %v4331_v1, %v1157_v5  ;;  %v1533_v12 = vpop.f32.mrb[19].mxu0  ;;  %v1709_v2 = vpop.f32.mrb[19].mxu1  ;;  %v1787_v33 = vmax.f32 %v1539_v54, 0.0  ;;  %v1831_v35 = vmax.f32 %v1715_v49, 0.0 }
 0x1f5   : > { %v1534_v44 = vadd.f32 %v1533_v12, %v5251_v17  ;;  %v1710_v10 = vadd.f32 %v1709_v2, %v1147_v38  ;;  %v1785_v15 = vmax.f32 %v1531_v0, 0.0  ;;  %v1829_v62 = vmax.f32 %v1707_v50, 0.0 }
 0x1f6   : > { %v1788_v56 = vmax.f32 %v1542_v7, 0.0  ;;  %v1832_v22 = vmax.f32 %v1718_v47, 0.0 }
 0x1f7   : > { %v1786_v32 = vmax.f32 %v1534_v44, 0.0  ;;  %v1830_v63 = vmax.f32 %v1710_v10, 0.0 }
 0x1f8   : > { %v5544_v13 = vpack.c.bf16 %v1788_v56, %v1787_v33  ;;  %v5546_v29 = vpack.c.bf16 %v1832_v22, %v1831_v35 }
 0x1f9   : > { %v5548_v34 = vpack.c.bf16 %v1786_v32, %v1785_v15  ;;  %v5550_v21 = vpack.c.bf16 %v1830_v63, %v1829_v62  ;;  %v4290_v11 = vpop.f32.mrb[20].mxu0  ;;  %v4334_v1 = vpop.f32.mrb[20].mxu1 }
 0x1fa   : > { %v1555_v17 = vadd.f32 %v4290_v11, %v5295_v42  ;;  %v1731_v12 = vadd.f32 %v4334_v1, %v1172_v16  ;;  %v1546_v2 = vpop.f32.mrb[21].mxu0  ;;  %v1722_v7 = vpop.f32.mrb[21].mxu1 }
 0x1fb   : > { %v1547_v47 = vadd.f32 %v1546_v2, %v5281_v26  ;;  %v1723_v44 = vadd.f32 %v1722_v7, %v5478_v8  ;;  %v4291_v10 = vpop.f32.mrb[22].mxu0  ;;  %v4335_v33 = vpop.f32.mrb[22].mxu1 }
 0x1fc   : > { %v1558_v56 = vadd.f32 %v4291_v10, %v5293_v41  ;;  %v1734_v35 = vadd.f32 %v4335_v33, %v5484_v9  ;;  %v1549_v49 = vpop.f32.mrb[23].mxu0  ;;  %v1725_v63 = vpop.f32.mrb[23].mxu1  ;;  %v1791_v42 = vmax.f32 %v1555_v17, 0.0  ;;  %v1835_v16 = vmax.f32 %v1731_v12, 0.0 }
 0x1fd   : > { %v1550_v50 = vadd.f32 %v1549_v49, %v5279_v25  ;;  %v1726_v5 = vadd.f32 %v1725_v63, %v5476_v58  ;;  %v1789_v38 = vmax.f32 %v1547_v47, 0.0  ;;  %v1833_v26 = vmax.f32 %v1723_v44, 0.0 }
 0x1fe   : > { %v1792_v54 = vmax.f32 %v1558_v56, 0.0  ;;  %v1836_v0 = vmax.f32 %v1734_v35, 0.0 }
 0x1ff   : > { %v1790_v39 = vmax.f32 %v1550_v50, 0.0  ;;  %v1834_v8 = vmax.f32 %v1726_v5, 0.0 }
 0x200   : > { %v5559_v22 = vpack.c.bf16 %v1792_v54, %v1791_v42  ;;  %v5561_v15 = vpack.c.bf16 %v1836_v0, %v1835_v16 }
 0x201   : > { %v5563_v41 = vpack.c.bf16 %v1790_v39, %v1789_v38  ;;  %v5565_v9 = vpack.c.bf16 %v1834_v8, %v1833_v26  ;;  %v4294_v62 = vpop.f32.mrb[24].mxu0  ;;  %v4338_v25 = vpop.f32.mrb[24].mxu1 }
 0x202   : > { %v1571_v58 = vadd.f32 %v4294_v62, %v5325_v3  ;;  %v1747_v32 = vadd.f32 %v4338_v25, %v5509_v53  ;;  %v1562_v11 = vpop.f32.mrb[25].mxu0  ;;  %v1738_v1 = vpop.f32.mrb[25].mxu1 }
 0x203   : > { %v1563_v17 = vadd.f32 %v1562_v11, %v5311_v60  ;;  %v1739_v12 = vadd.f32 %v1738_v1, %v5492_v4  ;;  %v4295_v2 = vpop.f32.mrb[26].mxu0  ;;  %v4339_v7 = vpop.f32.mrb[26].mxu1 }
 0x204   : > { %v1574_v47 = vadd.f32 %v4295_v2, %v5323_v43  ;;  %v1750_v44 = vadd.f32 %v4339_v7, %v5507_v52  ;;  %v1565_v10 = vpop.f32.mrb[27].mxu0  ;;  %v1741_v33 = vpop.f32.mrb[27].mxu1  ;;  %v1795_v35 = vmax.f32 %v1571_v58, 0.0  ;;  %v1839_v53 = vmax.f32 %v1747_v32, 0.0 }
 0x205   : > { %v1566_v56 = vadd.f32 %v1565_v10, %v5309_v48  ;;  %v1742_v3 = vadd.f32 %v1741_v33, %v5490_v59  ;;  %v1793_v50 = vmax.f32 %v1563_v17, 0.0  ;;  %v1837_v60 = vmax.f32 %v1739_v12, 0.0 }
 0x206   : > { %v1796_v49 = vmax.f32 %v1574_v47, 0.0  ;;  %v1840_v63 = vmax.f32 %v1750_v44, 0.0 }
 0x207   : > { %v1794_v5 = vmax.f32 %v1566_v56, 0.0  ;;  %v1838_v4 = vmax.f32 %v1742_v3, 0.0 }
 0x208   : > { %v5575_v42 = vpack.c.bf16 %v1796_v49, %v1795_v35  ;;  %v5577_v16 = vpack.c.bf16 %v1840_v63, %v1839_v53 }
 0x209   : > { %v5579_v43 = vpack.c.bf16 %v1794_v5, %v1793_v50  ;;  %v5581_v52 = vpack.c.bf16 %v1838_v4, %v1837_v60  ;;  %v4298_v54 = vpop.f32.mrb[28].mxu0  ;;  %v4342_v48 = vpop.f32.mrb[28].mxu1 }
 0x20a   : > { %v1587_v59 = vadd.f32 %v4298_v54, %v5398_v51  ;;  %v1763_v0 = vadd.f32 %v4342_v48, %v5526_v31  ;;  %v1578_v38 = vpop.f32.mrb[29].mxu0  ;;  %v1754_v26 = vpop.f32.mrb[29].mxu1 }
 0x20b   : > { %v1579_v39 = vadd.f32 %v1578_v38, %v5353_v46  ;;  %v1755_v8 = vadd.f32 %v1754_v26, %v5518_v30  ;;  %v4299_v62 = vpop.f32.mrb[30].mxu0  ;;  %v4343_v25 = vpop.f32.mrb[30].mxu1 }
 0x20c   : > { %v1590_v58 = vadd.f32 %v4299_v62, %v5396_v6  ;;  %v1766_v32 = vadd.f32 %v4343_v25, %v5524_v55  ;;  %v1581_v11 = vpop.f32.mrb[31].mxu0  ;;  %v1757_v1 = vpop.f32.mrb[31].mxu1  ;;  %v1799_v12 = vmax.f32 %v1587_v59, 0.0  ;;  %v1843_v31 = vmax.f32 %v1763_v0, 0.0 }
 0x20d   : > { %v1582_v17 = vadd.f32 %v1581_v11, %v5351_v45  ;;  %v1758_v51 = vadd.f32 %v1757_v1, %v5516_v61  ;;  %v1797_v47 = vmax.f32 %v1579_v39, 0.0  ;;  %v1841_v46 = vmax.f32 %v1755_v8, 0.0 }
 0x20e   : > { %v1800_v2 = vmax.f32 %v1590_v58, 0.0  ;;  %v1844_v7 = vmax.f32 %v1766_v32, 0.0 }
 0x20f   : > { %v1798_v44 = vmax.f32 %v1582_v17, 0.0  ;;  %v1842_v30 = vmax.f32 %v1758_v51, 0.0 }
 0x210   : > { %v5591_v10 = vpack.c.bf16 %v1800_v2, %v1799_v12  ;;  %v5593_v33 = vpack.c.bf16 %v1844_v7, %v1843_v31 }
 0x211   : > { %v5595_v6 = vpack.c.bf16 %v1798_v44, %v1797_v47  ;;  %v5597_v55 = vpack.c.bf16 %v1842_v30, %v1841_v46  ;;  %v4302_v56 = vpop.f32.mrb[32].mxu0  ;;  %v4346_v45 = vpop.f32.mrb[32].mxu1 }
 0x212   : > { %v1603_v61 = vadd.f32 %v4302_v56, %v5259_v20  ;;  %v1779_v3 = vadd.f32 %v4346_v45, %v5538_v40  ;;  %v1594_v35 = vpop.f32.mrb[33].mxu0  ;;  %v1770_v53 = vpop.f32.mrb[33].mxu1  ;;  %v6174_v56 = vld [vmem:[#allocation6_spill] sm:$0xff] }
 0x213   : > { %v1595_v49 = vadd.f32 %v1594_v35, %v5245_v14  ;;  %v1771_v63 = vadd.f32 %v1770_v53, %v5534_v37  ;;  %v4303_v50 = vpop.f32.mrb[34].mxu0  ;;  %v4347_v60 = vpop.f32.mrb[34].mxu1 }
 0x214   : > { %v1606_v5 = vadd.f32 %v4303_v50, %v5257_v19  ;;  %v1782_v4 = vadd.f32 %v4347_v60, %v5536_v57  ;;  %v1597_v54 = vpop.f32.mrb[35].mxu0  ;;  %v1773_v48 = vpop.f32.mrb[35].mxu1  ;;  %v1803_v0 = vmax.f32 %v1603_v61, 0.0  ;;  %v1847_v40 = vmax.f32 %v1779_v3, 0.0  ;;  %v6176_v3 = vld [vmem:[#allocation5_spill] sm:$0xff] }
 0x215   : > { %v1598_v59 = vadd.f32 %v1597_v54, %v5253_v18  ;;  %v1774_v20 = vadd.f32 %v1773_v48, %v5532_v36  ;;  %v1801_v39 = vmax.f32 %v1595_v49, 0.0  ;;  %v1845_v14 = vmax.f32 %v1771_v63, 0.0 }
 0x216   : > { %v1804_v38 = vmax.f32 %v1606_v5, 0.0  ;;  %v1848_v26 = vmax.f32 %v1782_v4, 0.0  ;;  %v6177_v4 = vld [vmem:[#allocation12_spill] sm:$0xff] }
 0x217   : > { %v1802_v8 = vmax.f32 %v1598_v59, 0.0  ;;  %v1846_v37 = vmax.f32 %v1774_v20, 0.0  ;;  %v6178_v59 = vld [vmem:[#allocation10_spill] sm:$0xff] }
 0x218   : > { %v1858_v62 = vpack.c.bf16 %v1804_v38, %v1803_v0  ;;  %v5607_v25 = vpack.c.bf16 %v1848_v26, %v1847_v40  ;;  %v6180_v26 = vld [vmem:[#allocation9_spill] sm:$0xff] }
 0x219   : > { %v1857_v19 = vpack.c.bf16 %v1802_v8, %v1801_v39  ;;  %v5609_v58 = vpack.c.bf16 %v1846_v37, %v1845_v14  ;;  %v4306_v57 = vpop.f32.mrb[36].mxu0 }
 0x21a   : > { %v1619_v32 = vadd.f32 %v4306_v57, %v5287_v28  ;;  %v1610_v18 = vpop.f32.mrb[37].mxu0 }
 0x21b   : > { %v1611_v36 = vadd.f32 %v1610_v18, %v5273_v24  ;;  %v4307_v11 = vpop.f32.mrb[38].mxu0  ;;  %4080 = vmatprep.subr.bf16.mxu1 %v1857_v19  ;;  %v6173_v24 = vld [vmem:[#allocation8_spill] sm:$0xff] }
 0x21c   : > { %v1622_v1 = vadd.f32 %v4307_v11, %v5285_v27  ;;  %v1613_v17 = vpop.f32.mrb[39].mxu0  ;;  %4081 = vmatpush3.bf16.msra.mxu1 %v5548_v34  ;;  %v1807_v12 = vmax.f32 %v1619_v32, 0.0  ;;  %v6175_v34 = vld [vmem:[#allocation7_spill] sm:$0xff]  ;;  %v6181_v32 = vld [vmem:[#allocation16_spill] sm:$0xff]  ;;  %v6182_v11 = vld [vmem:[#allocation14_spill] sm:$0xff] }
 0x21d   : > { %v1614_v51 = vadd.f32 %v1613_v17, %v5271_v23  ;;  %4082 = vmatprep.subr.bf16.mxu1 %v1858_v62  ;;  %v1805_v2 = vmax.f32 %v1611_v36, 0.0 }
 0x21e   : > { %v1808_v31 = vmax.f32 %v1622_v1, 0.0 }
 0x21f   : > { %v1806_v7 = vmax.f32 %v1614_v51, 0.0 }
 0x220   : > { %v1860_v47 = vpack.c.bf16 %v1808_v31, %v1807_v12  ;;  %4083 = vmatpush3.bf16.msra.mxu1 %v5544_v13  ;;  %v6184_v31 = vld [vmem:[#allocation13_spill] sm:$0xff] }
 0x221   : > { %v1859_v28 = vpack.c.bf16 %v1806_v7, %v1805_v2  ;;  %v4310_v46 = vpop.f32.mrb[40].mxu0 }
 0x222   : > { %v1635_v44 = vadd.f32 %v4310_v46, %v6173_v24  ;;  %v1626_v30 = vpop.f32.mrb[41].mxu0  ;;  %v6185_v24 = vld [vmem:[#allocation19_spill] sm:$0xff] }
 0x223   : > { %v1627_v27 = vadd.f32 %v1626_v30, %v6174_v56  ;;  %v4311_v45 = vpop.f32.mrb[42].mxu0  ;;  %4084 = vmatprep.subr.bf16.mxu1 %v1859_v28 }
 0x224   : > { %v1638_v61 = vadd.f32 %v4311_v45, %v6175_v34  ;;  %v1629_v23 = vpop.f32.mrb[43].mxu0  ;;  %4085 = vmatpush3.bf16.msra.mxu1 %v5563_v41  ;;  %v1811_v53 = vmax.f32 %v1635_v44, 0.0  ;;  %v6179_v41 = vld [vmem:[#allocation11_spill] sm:$0xff]  ;;  %v5641_v44 = vcombine.low %v6185_v24, %v6185_v24  ;;  %v6186_v45 = vld [vmem:[#allocation22_spill] sm:$0xff]  ;;  %v6194_v24 = vld [vmem:[#allocation20_spill] sm:$0xff] }
 0x225   : > { %v1630_v35 = vadd.f32 %v1629_v23, %v6176_v3  ;;  %4086 = vmatprep.subr.bf16.mxu1 %v1860_v47  ;;  %v1809_v13 = vmax.f32 %v1627_v27, 0.0  ;;  %v6187_v23 = vld [vmem:[#allocation18_spill] sm:$0xff] }
 0x226   : > { %v1812_v49 = vmax.f32 %v1638_v61, 0.0 }
 0x227   : > { %v1810_v63 = vmax.f32 %v1630_v35, 0.0 }
 0x228   : > { %v1862_v50 = vpack.c.bf16 %v1812_v49, %v1811_v53  ;;  %4087 = vmatpush3.bf16.msra.mxu1 %v5559_v22  ;;  %v6188_v53 = vld [vmem:[#allocation21_spill] sm:$0xff] }
 0x229   : > { %v1861_v60 = vpack.c.bf16 %v1810_v63, %v1809_v13  ;;  %v4314_v5 = vpop.f32.mrb[44].mxu0 }
 0x22a   : > { %v1651_v54 = vadd.f32 %v4314_v5, %v6177_v4  ;;  %v1642_v48 = vpop.f32.mrb[45].mxu0 }
 0x22b   : > { %v1643_v20 = vadd.f32 %v1642_v48, %v6178_v59  ;;  %v4315_v0 = vpop.f32.mrb[46].mxu0  ;;  %4088 = vmatprep.subr.bf16.mxu1 %v1861_v60  ;;  %v6190_v59 = vld [vmem:[#allocation26_spill] sm:$0xff] }
 0x22c   : > { %v1654_v40 = vadd.f32 %v4315_v0, %v6179_v41  ;;  %v1645_v38 = vpop.f32.mrb[47].mxu0  ;;  %4089 = vmatpush3.bf16.msra.mxu1 %v5579_v43  ;;  %v1815_v14 = vmax.f32 %v1651_v54, 0.0  ;;  %v6183_v43 = vld [vmem:[#allocation15_spill] sm:$0xff]  ;;  %v6191_v41 = vld [vmem:[#allocation24_spill] sm:$0xff] }
 0x22d   : > { %v1646_v39 = vadd.f32 %v1645_v38, %v6180_v26  ;;  %4090 = vmatprep.subr.bf16.mxu1 %v1862_v50  ;;  %v1813_v22 = vmax.f32 %v1643_v20, 0.0  ;;  %v6192_v26 = vld [vmem:[#allocation25_spill] sm:$0xff] }
 0x22e   : > { %v1816_v8 = vmax.f32 %v1654_v40, 0.0 }
 0x22f   : > { %v1814_v37 = vmax.f32 %v1646_v39, 0.0 }
 0x230   : > { %v1864_v62 = vpack.c.bf16 %v1816_v8, %v1815_v14  ;;  %4091 = vmatpush3.bf16.msra.mxu1 %v5575_v42  ;;  %v5637_v42 = vld [vmem:[%s6142_s4 + $0x8] sm:$0xff] }
 0x231   : > { %v1863_v19 = vpack.c.bf16 %v1814_v37, %v1813_v22  ;;  %v4318_v57 = vpop.f32.mrb[48].mxu0 }
 0x232   : > { %v1667_v18 = vadd.f32 %v4318_v57, %v6181_v32  ;;  %v1658_v36 = vpop.f32.mrb[49].mxu0  ;;  %v5668_v32 = vld [vmem:[%s4778_s26 + $0x10] sm:$0xf] }
 0x233   : > { %v1659_v1 = vadd.f32 %v1658_v36, %v6182_v11  ;;  %v4319_v17 = vpop.f32.mrb[50].mxu0  ;;  %4092 = vmatprep.subr.bf16.mxu1 %v1863_v19  ;;  %v4570_v36 = vld [vmem:[%s6139_s1 + $0x10] sm:$0xff]   ;;  %v4571_v11 = vld [vmem:[%s6139_s1 + $0x18] sm:$0xff]  }
 0x234   : > { %v1670_v51 = vadd.f32 %v4319_v17, %v6183_v43  ;;  %v1661_v12 = vpop.f32.mrb[51].mxu0  ;;  %4093 = vmatpush3.bf16.msra.mxu1 %v5595_v6  ;;  %v1819_v7 = vmax.f32 %v1667_v18, 0.0  ;;  %v3897_v6 = vcombine.high %v5637_v42, %v5637_v42  ;;  %v5671_v18 = vld [vmem:[%s4778_s26 + $0x14] sm:$0xf]  ;;  %v4572_v17 = vld [vmem:[%s6139_s1 + $0x20] sm:$0xff]  }
 0x235   : > { %v1662_v2 = vadd.f32 %v1661_v12, %v6184_v31  ;;  %4094 = vmatprep.subr.bf16.mxu1 %v1864_v62  ;;  %v1817_v28 = vmax.f32 %v1659_v1, 0.0  ;;  %v5700_v1 = vpop.permute.xlu0 %2721 }
 0x236   : > { %v1820_v47 = vmax.f32 %v1670_v51, 0.0  ;;  %v4573_v51 = vld [vmem:[%s6139_s1 + $0x28] sm:$0xff]  }
 0x237   : > { %v1818_v46 = vmax.f32 %v1662_v2, 0.0  ;;  %v4574_v2 = vld [vmem:[%s6139_s1 + $0x30] sm:$0xff]  }
 0x238   : > { %v1866_v30 = vpack.c.bf16 %v1820_v47, %v1819_v7  ;;  %4095 = vmatpush3.bf16.msra.mxu1 %v5591_v10  ;;  %v6189_v10 = vld [vmem:[#allocation17_spill] sm:$0xff]  ;;  %v4575_v7 = vld [vmem:[%s6139_s1 + $0x38] sm:$0xff]  }
 0x239   : > { %v1865_v56 = vpack.c.bf16 %v1818_v46, %v1817_v28  ;;  %v4322_v27 = vpop.f32.mrb[52].mxu0  ;;  %4102 = vmatprep.subr.bf16.mxu1 %v5565_v9  ;;  %v5707_v43 = vpop.permute.xlu0 %2641 }
 0x23a   : > { %v1683_v34 = vadd.f32 %v4322_v27, %v6186_v45  ;;  %v1674_v61 = vpop.f32.mrb[53].mxu0 }
 0x23b   : > { %v1675_v3 = vadd.f32 %v1674_v61, %v6187_v23  ;;  %v4323_v35 = vpop.f32.mrb[54].mxu0  ;;  %1936 = vmatmul.mubr.bf16.vlgmr.msra.gmra.mrb[36].mxu1 %v5641_v44 }
 0x23c   : > { %v1686_v49 = vadd.f32 %v4323_v35, %v6188_v53  ;;  %v1677_v13 = vpop.f32.mrb[55].mxu0  ;;  %4103 = vmatpush3.bf16.msra.mxu1 %v1865_v56  ;;  %1975 = vmatprep.mubr.bf16.mxu1 %v3897_v6  ;;  %v1823_v50 = vmax.f32 %v1683_v34, 0.0 }
 0x23d   : > { %v1678_v63 = vadd.f32 %v1677_v13, %v6189_v10  ;;  %4104 = vmatprep.subr.bf16.mxu1 %v5561_v15  ;;  %v1821_v9 = vmax.f32 %v1675_v3, 0.0  ;;  %v6193_v15 = vld [vmem:[#allocation23_spill] sm:$0xff]  ;;  %v5712_v12 = vpop.permute.xlu0 %2731  ;;  %v6195_v3 = vmov 0  }
 0x23e   : > { %v1824_v60 = vmax.f32 %v1686_v49, 0.0  ;;  %v2489_v35 = vmax.bf16 %v6195_v3, %v5668_v32  ;;  %v2490_v53 = vmax.bf16 %v6195_v3, %v5671_v18 }
 0x23f   : > { %v1822_v5 = vmax.f32 %v1678_v63, 0.0 }
 0x240   : > { %v1868_v4 = vpack.c.bf16 %v1824_v60, %v1823_v50  ;;  %4105 = vmatpush3.bf16.msra.mxu1 %v1866_v30  ;;  %v3942_v49 = vcombine.low %v2489_v35, %v2490_v53 }
 0x241   : > { %v1867_v54 = vpack.c.bf16 %v1822_v5, %v1821_v9  ;;  %v4326_v48 = vpop.f32.mrb[56].mxu0  ;;  %4106 = vmatprep.subr.bf16.mxu1 %v5581_v52  ;;  %v5716_v31 = vpop.permute.xlu0 %2651 }
 0x242   : > { %v1699_v20 = vadd.f32 %v4326_v48, %v6190_v59  ;;  %v1690_v0 = vpop.f32.mrb[57].mxu0  ;;  %4396 = vmatprep.subr.bf16.mxu0 %v3942_v49 }
 0x243   : > { %v1691_v40 = vadd.f32 %v1690_v0, %v6191_v41  ;;  %v4327_v38 = vpop.f32.mrb[58].mxu0  ;;  %4397 = vmatpush3.bf16.msra.mxu0 %v3942_v49 }
 0x244   : > { %v1702_v39 = vadd.f32 %v4327_v38, %v6192_v26  ;;  %v1693_v14 = vpop.f32.mrb[59].mxu0  ;;  %4107 = vmatpush3.bf16.msra.mxu1 %v1867_v54  ;;  %v1827_v22 = vmax.f32 %v1699_v20, 0.0  ;;  %v4576_v20 = vld [vmem:[%s6140_s2] sm:$0xff]  }
 0x245   : > { %v1694_v8 = vadd.f32 %v1693_v14, %v6193_v15  ;;  %4108 = vmatprep.subr.bf16.mxu1 %v5577_v16  ;;  %v1825_v62 = vmax.f32 %v1691_v40, 0.0  ;;  %v4566_v16 = vld [vmem:[%s6139_s1] sm:$0xff]   ;;  %4404 = vmatprep.mubr.msk.bf16.mxu0 %vm1399_vm1, %v4576_v20 }
 0x246   : > { %v1828_v37 = vmax.f32 %v1702_v39, 0.0 }
 0x247   : > { %v1826_v52 = vmax.f32 %v1694_v8, 0.0 }
 0x248   : > { %v1870_v19 = vpack.c.bf16 %v1828_v37, %v1827_v22  ;;  %4109 = vmatpush3.bf16.msra.mxu1 %v1868_v4 }
 0x249   : > { %v1869_v57 = vpack.c.bf16 %v1826_v52, %v1825_v62  ;;  %4110 = vmatprep.subr.bf16.mxu1 %v5597_v55  ;;  %v3902_v55 = vcombine.low %v5668_v32, %v5671_v18 }
 0x24c   : > { %4111 = vmatpush3.bf16.msra.mxu1 %v1869_v57 }
 0x24d   : > { %4112 = vmatprep.subr.bf16.mxu1 %v5593_v33  ;;  %v3896_v33 = vcombine.low %v5637_v42, %v5637_v42  ;;  %v5723_v42 = vpop.permute.xlu0 %2741 }
 0x250   : > { %4113 = vmatpush3.bf16.msra.mxu1 %v1870_v19 }
 0x251   : > { %4114 = vmatprep.subr.bf16.mxu1 %v5609_v58  ;;  %v5686_v58 = vld [vmem:[%s4778_s26 + $0x1c] sm:$0xf]  ;;  %v5730_v47 = vpop.permute.xlu0 %2661 }
 0x252   : > { %v2492_v9 = vmax.bf16 %v6195_v3, %v5686_v58 }
 0x254   : > { %4115 = vmatpush3.bf16.msra.mxu1 %v5550_v21  ;;  %v4569_v21 = vld [vmem:[%s6139_s1 + $0x8] sm:$0xff]  }
 0x255   : > { %4116 = vmatprep.subr.bf16.mxu1 %v5607_v25  ;;  %v5683_v25 = vld [vmem:[%s4778_s26 + $0x18] sm:$0xf]  ;;  %v5732_v28 = vpop.permute.xlu0 %2751 }
 0x256   : > { %v2491_v60 = vmax.bf16 %v6195_v3, %v5683_v25 }
 0x258   : > { %4117 = vmatpush3.bf16.msra.mxu1 %v5546_v29  ;;  %v3903_v29 = vcombine.low %v5683_v25, %v5686_v58  ;;  %v3943_v5 = vcombine.low %v2491_v60, %v2492_v9 }
 0x259   : > { %4348 = vmatprep.subr.bf16.mxu1 %v4566_v16  ;;  %v5736_v46 = vpop.permute.xlu0 %2671 }
 0x25a   : > { %4398 = vmatprep.subr.bf16.mxu0 %v3943_v5 }
 0x25b   : > { %1976 = vmatmul.mubr.bf16.vlgmr.msra.gmra.mrb[40].mxu1 %v3896_v33  ;;  %4399 = vmatpush3.bf16.msra.mxu0 %v3943_v5 }
 0x25c   : > { %4349 = vmatpush3.bf16.msra.mxu1 %v4566_v16  ;;  %4350 = vmatprep.mubr.msk.bf16.mxu1 %vm279_vm0, %v3902_v55 }
 0x25d   : > { %4354 = vmatprep.subr.bf16.mxu1 %v4569_v21  ;;  %v5740_v30 = vpop.permute.xlu0 %2761 }
 0x261   : > { %v5742_v6 = vpop.permute.xlu0 %2681 }
 0x263   : > { %4351 = vmatmul.mubr.msk.bf16.vlgmr.msra.gmra.mrb[44].mxu1 %vm279_vm0, %v3903_v29 }
 0x264   : > { %4355 = vmatpush3.bf16.msra.mxu1 %v4569_v21  ;;  %4356 = vmatprep.mubr.msk.bf16.mxu1 %vm279_vm0, %v3902_v55 }
 0x265   : > { %4360 = vmatprep.subr.bf16.mxu1 %v4570_v36  ;;  %v5744_v56 = vpop.permute.xlu0 %2771 }
 0x269   : > { %v5746_v27 = vpop.permute.xlu0 %2691 }
 0x26b   : > { %4357 = vmatmul.mubr.msk.bf16.vlgmr.msra.gmra.mrb[48].mxu1 %vm279_vm0, %v3903_v29 }
 0x26c   : > { %4361 = vmatpush3.bf16.msra.mxu1 %v4570_v36  ;;  %4362 = vmatprep.mubr.msk.bf16.mxu1 %vm279_vm0, %v3902_v55 }
 0x26d   : > { %4366 = vmatprep.subr.bf16.mxu1 %v4571_v11  ;;  %v5748_v45 = vpop.permute.xlu0 %2781 }
 0x271   : > { %v5750_v34 = vpop.permute.xlu0 %2701 }
 0x273   : > { %4363 = vmatmul.mubr.msk.bf16.vlgmr.msra.gmra.mrb[52].mxu1 %vm279_vm0, %v3903_v29 }
 0x274   : > { %4367 = vmatpush3.bf16.msra.mxu1 %v4571_v11  ;;  %4368 = vmatprep.mubr.msk.bf16.mxu1 %vm279_vm0, %v3902_v55 }
 0x275   : > { %4372 = vmatprep.subr.bf16.mxu1 %v4572_v17  ;;  %v5752_v61 = vpop.permute.xlu0 %2791 }
 0x279   : > { %v5754_v23 = vpop.permute.xlu0 %2711 }
 0x27b   : > { %4369 = vmatmul.mubr.msk.bf16.vlgmr.msra.gmra.mrb[56].mxu1 %vm279_vm0, %v3903_v29 }
 0x27c   : > { %4373 = vmatpush3.bf16.msra.mxu1 %v4572_v17  ;;  %4374 = vmatprep.mubr.msk.bf16.mxu1 %vm279_vm0, %v3902_v55 }
 0x27d   : > { %4378 = vmatprep.subr.bf16.mxu1 %v4573_v51  ;;  %v5760_v13 = vpop.permute.xlu0 %2881 }
 0x281   : > { %v5762_v10 = vpop.permute.xlu0 %2801 }
 0x283   : > { %4375 = vmatmul.mubr.msk.bf16.vlgmr.msra.gmra.mrb[60].mxu1 %vm279_vm0, %v3903_v29 }
 0x284   : > { %4379 = vmatpush3.bf16.msra.mxu1 %v4573_v51  ;;  %4380 = vmatprep.mubr.msk.bf16.mxu1 %vm279_vm0, %v3902_v55 }
 0x285   : > { %4384 = vmatprep.subr.bf16.mxu1 %v4574_v2  ;;  %v5764_v63 = vpop.permute.xlu0 %2891 }
 0x289   : > { %v5766_v50 = vpop.permute.xlu0 %2811 }
 0x28b   : > { %4381 = vmatmul.mubr.msk.bf16.vlgmr.msra.gmra.mrb[64].mxu1 %vm279_vm0, %v3903_v29 }
 0x28c   : > { %4385 = vmatpush3.bf16.msra.mxu1 %v4574_v2  ;;  %4386 = vmatprep.mubr.msk.bf16.mxu1 %vm279_vm0, %v3902_v55 }
 0x28d   : > { %4390 = vmatprep.subr.bf16.mxu1 %v4575_v7  ;;  %v5772_v4 = vpop.permute.xlu0 %2901 }
 0x291   : > { %v5774_v54 = vpop.permute.xlu0 %2821 }
 0x293   : > { %4387 = vmatmul.mubr.msk.bf16.vlgmr.msra.gmra.mrb[68].mxu1 %vm279_vm0, %v3903_v29 }
 0x294   : > { %4391 = vmatpush3.bf16.msra.mxu1 %v4575_v7  ;;  %4392 = vmatprep.mubr.msk.bf16.mxu1 %vm279_vm0, %v3902_v55 }
 0x295   : > { %v5776_v48 = vpop.permute.xlu0 %2911 }
 0x299   : > { %v5778_v59 = vpop.permute.xlu0 %2831 }
 0x29b   : > { %4393 = vmatmul.mubr.msk.bf16.vlgmr.msra.gmra.mrb[72].mxu1 %vm279_vm0, %v3903_v29 }
 0x29c   : > { %3654 = vmatprep.mubr.bf16.mxu1 %v6194_v24 }
 0x29d   : > { %v5783_v0 = vpop.permute.xlu0 %2921 }
 0x2a1   : > { %v5786_v41 = vpop.permute.xlu0 %2841 }
 0x2a5   : > { %v5788_v40 = vpop.permute.xlu0 %2931 }
 0x2a9   : > { %v5790_v15 = vpop.permute.xlu0 %2851 }
 0x2ad   : > { %v5792_v22 = vpop.permute.xlu0 %2941 }
 0x2ae   : > { %6196 = vst [vmem:[#allocation8_spill] sm:$0xff] %v5792_v22 }
 0x2b1   : > { %v5794_v37 = vpop.permute.xlu0 %2861 }
 0x2b5   : > { %v5796_v62 = vpop.permute.xlu0 %2951 }
 0x2b6   : > { %6197 = vst [vmem:[#allocation6_spill] sm:$0xff] %v5796_v62 }
 0x2b9   : > { %v5798_v52 = vpop.permute.xlu0 %2871 }
 0x2bd   : > { %v1887_v57 = vpop.permute.xlu0 %1886 }
 0x30e   : > { %v4096_v38 = vpop.f32.mrb[36].mxu1 }
 0x30f   : > { %v4097_v26 = vpop.f32.mrb[37].mxu1 }
 0x310   : > { %v4098_v39 = vadd.f32 %v4097_v26, %v4096_v38  ;;  %v4099_v14 = vpop.f32.mrb[38].mxu1 }
 0x311   : > { %v4100_v8 = vpop.f32.mrb[39].mxu1 }
 0x312   : > { %v1938_v32 = vadd.f32 %v4098_v39, %v1887_v57 }
 0x32e   : > { %v4118_v19 = vpop.f32.mrb[40].mxu1 }
 0x32f   : > { %v4119_v16 = vpop.f32.mrb[41].mxu1 }
 0x330   : > { %v4120_v18 = vadd.f32 %v4119_v16, %v4118_v19  ;;  %v4121_v33 = vpop.f32.mrb[42].mxu1 }
 0x331   : > { %v4122_v55 = vpop.f32.mrb[43].mxu1 }
 0x332   : > { %v1978_v21 = vadd.f32 %v4120_v18, %v1938_v32 }
 0x334   : > { %1983 = vst.msk [vmem:[%s5803_s29] sm:$0xff] %vm279_vm0, %v1978_v21 }
 0x336   : > { %v4352_v25 = vpop.f32.mrb[44].mxu1 }
 0x337   : > { %v2047_v58 = vpop.f32.mrb[45].mxu1 }
 0x338   : > { %v4353_v29 = vpop.f32.mrb[46].mxu1 }
 0x339   : > { %v2050_v36 = vpop.f32.mrb[47].mxu1 }
 0x33e   : > { %v4358_v11 = vpop.f32.mrb[48].mxu1 }
 0x33f   : > { %v2121_v17 = vmax.f32 %v4352_v25, %v4358_v11  ;;  %v2104_v51 = vpop.f32.mrb[49].mxu1 }
 0x340   : > { %v2119_v2 = vmax.f32 %v2047_v58, %v2104_v51  ;;  %v4359_v7 = vpop.f32.mrb[50].mxu1 }
 0x341   : > { %v2122_v24 = vmax.f32 %v4353_v29, %v4359_v7  ;;  %v2107_v3 = vpop.f32.mrb[51].mxu1 }
 0x342   : > { %v2120_v35 = vmax.f32 %v2050_v36, %v2107_v3 }
 0x346   : > { %v4364_v53 = vpop.f32.mrb[52].mxu1 }
 0x347   : > { %v2182_v49 = vmax.f32 %v2121_v17, %v4364_v53  ;;  %v2165_v60 = vpop.f32.mrb[53].mxu1 }
 0x348   : > { %v2180_v9 = vmax.f32 %v2119_v2, %v2165_v60  ;;  %v4365_v5 = vpop.f32.mrb[54].mxu1 }
 0x349   : > { %v2183_v20 = vmax.f32 %v2122_v24, %v4365_v5  ;;  %v2168_v38 = vpop.f32.mrb[55].mxu1 }
 0x34a   : > { %v2181_v26 = vmax.f32 %v2120_v35, %v2168_v38 }
 0x34e   : > { %v4370_v39 = vpop.f32.mrb[56].mxu1 }
 0x34f   : > { %v2243_v14 = vmax.f32 %v2182_v49, %v4370_v39  ;;  %v2226_v8 = vpop.f32.mrb[57].mxu1 }
 0x350   : > { %v2241_v19 = vmax.f32 %v2180_v9, %v2226_v8  ;;  %v4371_v57 = vpop.f32.mrb[58].mxu1 }
 0x351   : > { %v2244_v16 = vmax.f32 %v2183_v20, %v4371_v57  ;;  %v2229_v32 = vpop.f32.mrb[59].mxu1 }
 0x352   : > { %v2242_v18 = vmax.f32 %v2181_v26, %v2229_v32 }
 0x356   : > { %v4376_v33 = vpop.f32.mrb[60].mxu1 }
 0x357   : > { %v2304_v55 = vmax.f32 %v2243_v14, %v4376_v33  ;;  %v2287_v21 = vpop.f32.mrb[61].mxu1 }
 0x358   : > { %v2302_v25 = vmax.f32 %v2241_v19, %v2287_v21  ;;  %v4377_v58 = vpop.f32.mrb[62].mxu1 }
 0x359   : > { %v2305_v29 = vmax.f32 %v2244_v16, %v4377_v58  ;;  %v2290_v36 = vpop.f32.mrb[63].mxu1 }
 0x35a   : > { %v2303_v11 = vmax.f32 %v2242_v18, %v2290_v36 }
 0x35e   : > { %v4382_v17 = vpop.f32.mrb[64].mxu1 }
 0x35f   : > { %v2365_v51 = vmax.f32 %v2304_v55, %v4382_v17  ;;  %v2348_v2 = vpop.f32.mrb[65].mxu1  ;;  %v4578_v17 = vld [vmem:[%s6140_s2 + $0x10] sm:$0xff]  }
 0x360   : > { %v2363_v7 = vmax.f32 %v2302_v25, %v2348_v2  ;;  %v4383_v24 = vpop.f32.mrb[66].mxu1  ;;  %v4580_v2 = vld [vmem:[%s6140_s2 + $0x20] sm:$0xff]  }
 0x361   : > { %v2366_v3 = vmax.f32 %v2305_v29, %v4383_v24  ;;  %v2351_v35 = vpop.f32.mrb[67].mxu1  ;;  %v4582_v24 = vld [vmem:[%s6140_s2 + $0x30] sm:$0xff]  }
 0x362   : > { %v2364_v53 = vmax.f32 %v2303_v11, %v2351_v35  ;;  %v4577_v11 = vld [vmem:[%s6140_s2 + $0x8] sm:$0xff]   ;;  %v4584_v35 = vld [vmem:[%s6140_s2 + $0x40] sm:$0xff]  }
 0x366   : > { %v4388_v49 = vpop.f32.mrb[68].mxu1 }
 0x367   : > { %v2426_v60 = vmax.f32 %v2365_v51, %v4388_v49  ;;  %v2409_v9 = vpop.f32.mrb[69].mxu1  ;;  %v4579_v51 = vld [vmem:[%s6140_s2 + $0x18] sm:$0xff]   ;;  %v4586_v49 = vld [vmem:[%s6140_s2 + $0x50] sm:$0xff]  }
 0x368   : > { %v2424_v5 = vmax.f32 %v2363_v7, %v2409_v9  ;;  %v4389_v20 = vpop.f32.mrb[70].mxu1  ;;  %v4581_v7 = vld [vmem:[%s6140_s2 + $0x28] sm:$0xff]   ;;  %v4588_v9 = vld [vmem:[%s6140_s2 + $0x60] sm:$0xff]  }
 0x369   : > { %v2427_v38 = vmax.f32 %v2366_v3, %v4389_v20  ;;  %v2412_v26 = vpop.f32.mrb[71].mxu1  ;;  %v4583_v3 = vld [vmem:[%s6140_s2 + $0x38] sm:$0xff]   ;;  %v4590_v20 = vld [vmem:[%s6140_s2 + $0x70] sm:$0xff]  }
 0x36a   : > { %v2425_v39 = vmax.f32 %v2364_v53, %v2412_v26  ;;  %v4585_v53 = vld [vmem:[%s6140_s2 + $0x48] sm:$0xff]   ;;  %v4592_v26 = vld [vmem:[%s6140_s2 + $0x80] sm:$0xff]  }
 0x36e   : > { %v4394_v14 = vpop.f32.mrb[72].mxu1 }
 0x36f   : > { %v2487_v8 = vmax.f32 %v2426_v60, %v4394_v14  ;;  %v2470_v19 = vpop.f32.mrb[73].mxu1  ;;  %v4587_v60 = vld [vmem:[%s6140_s2 + $0x58] sm:$0xff]   ;;  %v4594_v14 = vld [vmem:[%s6140_s2 + $0x90] sm:$0xff]  }
 0x370   : > { %v2485_v57 = vmax.f32 %v2424_v5, %v2470_v19  ;;  %v4395_v16 = vpop.f32.mrb[74].mxu1  ;;  %v4589_v5 = vld [vmem:[%s6140_s2 + $0x68] sm:$0xff]   ;;  %v4596_v19 = vld [vmem:[%s6140_s2 + $0xa0] sm:$0xff]  }
 0x371   : > { %v2488_v32 = vmax.f32 %v2427_v38, %v4395_v16  ;;  %v2473_v18 = vpop.f32.mrb[75].mxu1  ;;  %v2495_v55 = vmax.f32 %v2487_v8, 0.0  ;;  %v4591_v38 = vld [vmem:[%s6140_s2 + $0x78] sm:$0xff]   ;;  %v4598_v16 = vld [vmem:[%s6140_s2 + $0xb0] sm:$0xff]  }
 0x372   : > { %v2486_v33 = vmax.f32 %v2425_v39, %v2473_v18  ;;  %v2493_v25 = vmax.f32 %v2485_v57, 0.0  ;;  %v4593_v39 = vld [vmem:[%s6140_s2 + $0x88] sm:$0xff]   ;;  %v4595_v8 = vld [vmem:[%s6140_s2 + $0x98] sm:$0xff]   ;;  %v4600_v18 = vld [vmem:[%s6140_s2 + $0xc0] sm:$0xff]  }
 0x373   : > { %v2496_v21 = vmax.f32 %v2488_v32, 0.0  ;;  %v4597_v57 = vld [vmem:[%s6140_s2 + $0xa8] sm:$0xff]   ;;  %v4599_v32 = vld [vmem:[%s6140_s2 + $0xb8] sm:$0xff]  }
 0x374   : > { %v2494_v58 = vmax.f32 %v2486_v33, 0.0  ;;  %v4601_v33 = vld [vmem:[%s6140_s2 + $0xc8] sm:$0xff]  }
 0x375   : > { %v2498_v29 = vpack.c.bf16 %v2496_v21, %v2495_v55  ;;  %v4602_v55 = vld [vmem:[%s6140_s2 + $0xd0] sm:$0xff]   ;;  %v4603_v21 = vld [vmem:[%s6140_s2 + $0xd8] sm:$0xff]  }
 0x376   : > { %v2497_v36 = vpack.c.bf16 %v2494_v58, %v2493_v25  ;;  %v4604_v25 = vld [vmem:[%s6140_s2 + $0xe0] sm:$0xff]   ;;  %v4605_v58 = vld [vmem:[%s6140_s2 + $0xe8] sm:$0xff]  }
 0x378   : > { %4400 = vmatprep.subr.bf16.mxu0 %v2497_v36 }
 0x379   : > { %4401 = vmatpush3.bf16.msra.mxu0 %v2497_v36  ;;  %v5927_v36 = vpop.permute.xlu1 %2726 }
 0x37a   : > { %4402 = vmatprep.subr.bf16.mxu0 %v2498_v29 }
 0x37d   : > { %4403 = vmatpush3.bf16.msra.mxu0 %v2498_v29  ;;  %v4606_v29 = vld [vmem:[%s6140_s2 + $0xf0] sm:$0xff]  }
 0x380   : > { %4405 = vmatmul.mubr.msk.bf16.vlgmr.msra.gmra.mrb[60].mxu0 %vm1399_vm1, %v4577_v11  ;;  %v4607_v11 = vld [vmem:[%s6140_s2 + $0xf8] sm:$0xff]  }
 0x381   : > { %4408 = vmatprep.mubr.msk.bf16.mxu0 %vm1399_vm1, %v4578_v17  ;;  %v2647_v17 = vpop.permute.xlu1 %2646 }
 0x388   : > { %4409 = vmatmul.mubr.msk.bf16.gmra.mrb[64].mxu0 %vm1399_vm1, %v4579_v51  ;;  %v5933_v51 = vpop.permute.xlu1 %2736 }
 0x389   : > { %4412 = vmatprep.mubr.msk.bf16.mxu0 %vm1399_vm1, %v4580_v2 }
 0x38c   : > { %v2657_v2 = vpop.permute.xlu1 %2656 }
 0x390   : > { %4413 = vmatmul.mubr.msk.bf16.gmra.mrb[68].mxu0 %vm1399_vm1, %v4581_v7  ;;  %v5935_v7 = vpop.permute.xlu1 %2746 }
 0x391   : > { %4416 = vmatprep.mubr.msk.bf16.mxu0 %vm1399_vm1, %v4582_v24 }
 0x394   : > { %v2667_v24 = vpop.permute.xlu1 %2666 }
 0x398   : > { %4417 = vmatmul.mubr.msk.bf16.gmra.mrb[72].mxu0 %vm1399_vm1, %v4583_v3  ;;  %v5937_v3 = vpop.permute.xlu1 %2756 }
 0x399   : > { %4420 = vmatprep.mubr.msk.bf16.mxu0 %vm1399_vm1, %v4584_v35 }
 0x39c   : > { %v2677_v35 = vpop.permute.xlu1 %2676 }
 0x3a0   : > { %4421 = vmatmul.mubr.msk.bf16.gmra.mrb[76].mxu0 %vm1399_vm1, %v4585_v53  ;;  %v5939_v53 = vpop.permute.xlu1 %2766 }
 0x3a1   : > { %4424 = vmatprep.mubr.msk.bf16.mxu0 %vm1399_vm1, %v4586_v49 }
 0x3a4   : > { %v2687_v49 = vpop.permute.xlu1 %2686 }
 0x3a8   : > { %4425 = vmatmul.mubr.msk.bf16.gmra.mrb[80].mxu0 %vm1399_vm1, %v4587_v60  ;;  %v5941_v60 = vpop.permute.xlu1 %2776 }
 0x3a9   : > { %4428 = vmatprep.mubr.msk.bf16.mxu0 %vm1399_vm1, %v4588_v9 }
 0x3ac   : > { %v2697_v9 = vpop.permute.xlu1 %2696 }
 0x3b0   : > { %4429 = vmatmul.mubr.msk.bf16.gmra.mrb[84].mxu0 %vm1399_vm1, %v4589_v5  ;;  %v5943_v5 = vpop.permute.xlu1 %2786 }
 0x3b1   : > { %4432 = vmatprep.mubr.msk.bf16.mxu0 %vm1399_vm1, %v4590_v20 }
 0x3b4   : > { %v2707_v20 = vpop.permute.xlu1 %2706 }
 0x3b8   : > { %4433 = vmatmul.mubr.msk.bf16.gmra.mrb[88].mxu0 %vm1399_vm1, %v4591_v38  ;;  %v5945_v38 = vpop.permute.xlu1 %2796 }
 0x3b9   : > { %4436 = vmatprep.mubr.msk.bf16.mxu0 %vm1399_vm1, %v4592_v26 }
 0x3bc   : > { %v2717_v26 = vpop.permute.xlu1 %2716 }
 0x3c0   : > { %4437 = vmatmul.mubr.msk.bf16.gmra.mrb[92].mxu0 %vm1399_vm1, %v4593_v39  ;;  %v5947_v39 = vpop.permute.xlu1 %2886 }
 0x3c1   : > { %4440 = vmatprep.mubr.msk.bf16.mxu0 %vm1399_vm1, %v4594_v14 }
 0x3c8   : > { %4441 = vmatmul.mubr.msk.bf16.gmra.mrb[96].mxu0 %vm1399_vm1, %v4595_v8 }
 0x3c9   : > { %4444 = vmatprep.mubr.msk.bf16.mxu0 %vm1399_vm1, %v4596_v19 }
 0x3d0   : > { %4445 = vmatmul.mubr.msk.bf16.gmra.mrb[100].mxu0 %vm1399_vm1, %v4597_v57 }
 0x3d1   : > { %4448 = vmatprep.mubr.msk.bf16.mxu0 %vm1399_vm1, %v4598_v16 }
 0x3d8   : > { %4449 = vmatmul.mubr.msk.bf16.gmra.mrb[104].mxu0 %vm1399_vm1, %v4599_v32 }
 0x3d9   : > { %4452 = vmatprep.mubr.msk.bf16.mxu0 %vm1399_vm1, %v4600_v18 }
 0x3e0   : > { %4453 = vmatmul.mubr.msk.bf16.gmra.mrb[108].mxu0 %vm1399_vm1, %v4601_v33 }
 0x3e1   : > { %4456 = vmatprep.mubr.msk.bf16.mxu0 %vm1399_vm1, %v4602_v55 }
 0x3e8   : > { %4457 = vmatmul.mubr.msk.bf16.gmra.mrb[112].mxu0 %vm1399_vm1, %v4603_v21 }
 0x3e9   : > { %4460 = vmatprep.mubr.msk.bf16.mxu0 %vm1399_vm1, %v4604_v25  ;;  %v5951_v25 = vpop.permute.xlu1 %2806 }
 0x3f0   : > { %4461 = vmatmul.mubr.msk.bf16.gmra.mrb[116].mxu0 %vm1399_vm1, %v4605_v58 }
 0x3f1   : > { %4464 = vmatprep.mubr.msk.bf16.mxu0 %vm1399_vm1, %v4606_v29 }
 0x3f8   : > { %4465 = vmatmul.mubr.msk.bf16.gmra.mrb[120].mxu0 %vm1399_vm1, %v4607_v11 }
 0x453   : > { %v4406_v14 = vpop.f32.mrb[60].mxu0 }
 0x454   : > { %v3258_v8 = vadd.f32 %v4406_v14, %v5716_v31  ;;  %v3249_v19 = vpop.f32.mrb[61].mxu0 }
 0x455   : > { %v3250_v57 = vadd.f32 %v3249_v19, %v5707_v43  ;;  %v4407_v16 = vpop.f32.mrb[62].mxu0 }
 0x456   : > { %v3261_v32 = vadd.f32 %v4407_v16, %v2657_v2  ;;  %v3252_v18 = vpop.f32.mrb[63].mxu0  ;;  %v3506_v55 = vmax.f32 %v3258_v8, 0.0 }
 0x457   : > { %v3253_v33 = vadd.f32 %v3252_v18, %v2647_v17  ;;  %v3504_v58 = vmax.f32 %v3250_v57, 0.0  ;;  %v5959_v17 = vpop.permute.xlu1 %2896 }
 0x458   : > { %v3507_v21 = vmax.f32 %v3261_v32, 0.0 }
 0x459   : > { %v3505_v29 = vmax.f32 %v3253_v33, 0.0 }
 0x45a   : > { %v5953_v11 = vpack.c.bf16 %v3507_v21, %v3506_v55 }
 0x45b   : > { %v5955_v22 = vpack.c.bf16 %v3505_v29, %v3504_v58  ;;  %v4410_v62 = vpop.f32.mrb[64].mxu0  ;;  %v5966_v29 = vpop.permute.xlu1 %2816 }
 0x45c   : > { %v3274_v31 = vadd.f32 %v4410_v62, %v5736_v46  ;;  %v3265_v14 = vpop.f32.mrb[65].mxu0 }
 0x45d   : > { %v3266_v43 = vadd.f32 %v3265_v14, %v5730_v47  ;;  %v4411_v19 = vpop.f32.mrb[66].mxu0 }
 0x45e   : > { %v3277_v2 = vadd.f32 %v4411_v19, %v2677_v35  ;;  %v3268_v16 = vpop.f32.mrb[67].mxu0  ;;  %v3510_v32 = vmax.f32 %v3274_v31, 0.0 }
 0x45f   : > { %v3269_v8 = vadd.f32 %v3268_v16, %v2667_v24  ;;  %v3508_v57 = vmax.f32 %v3266_v43, 0.0 }
 0x460   : > { %v3511_v18 = vmax.f32 %v3277_v2, 0.0 }
 0x461   : > { %v3509_v33 = vmax.f32 %v3269_v8, 0.0 }
 0x462   : > { %v5961_v55 = vpack.c.bf16 %v3511_v18, %v3510_v32  ;;  %v5971_v32 = vpop.permute.xlu1 %2906 }
 0x463   : > { %v5963_v21 = vpack.c.bf16 %v3509_v33, %v3508_v57  ;;  %v4414_v58 = vpop.f32.mrb[68].mxu0 }
 0x464   : > { %v3290_v46 = vadd.f32 %v4414_v58, %v5746_v27  ;;  %v3281_v62 = vpop.f32.mrb[69].mxu0 }
 0x465   : > { %v3282_v47 = vadd.f32 %v3281_v62, %v5742_v6  ;;  %v4415_v35 = vpop.f32.mrb[70].mxu0 }
 0x466   : > { %v3293_v14 = vadd.f32 %v4415_v35, %v2697_v9  ;;  %v3284_v19 = vpop.f32.mrb[71].mxu0  ;;  %v3514_v31 = vmax.f32 %v3290_v46, 0.0 }
 0x467   : > { %v3285_v24 = vadd.f32 %v3284_v19, %v2687_v49  ;;  %v3512_v43 = vmax.f32 %v3282_v47, 0.0  ;;  %v5977_v47 = vpop.permute.xlu1 %2826 }
 0x468   : > { %v3515_v2 = vmax.f32 %v3293_v14, 0.0 }
 0x469   : > { %v3513_v16 = vmax.f32 %v3285_v24, 0.0 }
 0x46a   : > { %v5969_v8 = vpack.c.bf16 %v3515_v2, %v3514_v31 }
 0x46b   : > { %v5973_v18 = vpack.c.bf16 %v3513_v16, %v3512_v43  ;;  %v4418_v27 = vpop.f32.mrb[72].mxu0 }
 0x46c   : > { %v3306_v57 = vadd.f32 %v4418_v27, %v5754_v23  ;;  %v3297_v33 = vpop.f32.mrb[73].mxu0  ;;  %v5986_v27 = vpop.permute.xlu1 %2916 }
 0x46d   : > { %v3298_v6 = vadd.f32 %v3297_v33, %v5750_v34  ;;  %v4419_v58 = vpop.f32.mrb[74].mxu0 }
 0x46e   : > { %v3309_v9 = vadd.f32 %v4419_v58, %v2717_v26  ;;  %v3300_v62 = vpop.f32.mrb[75].mxu0  ;;  %v3518_v46 = vmax.f32 %v3306_v57, 0.0 }
 0x46f   : > { %v3301_v49 = vadd.f32 %v3300_v62, %v2707_v20  ;;  %v3516_v14 = vmax.f32 %v3298_v6, 0.0 }
 0x470   : > { %v3519_v35 = vmax.f32 %v3309_v9, 0.0 }
 0x471   : > { %v3517_v19 = vmax.f32 %v3301_v49, 0.0 }
 0x472   : > { %v5979_v24 = vpack.c.bf16 %v3519_v35, %v3518_v46 }
 0x473   : > { %v5981_v31 = vpack.c.bf16 %v3517_v19, %v3516_v14  ;;  %v4422_v2 = vpop.f32.mrb[76].mxu0  ;;  %v5990_v14 = vpop.permute.xlu1 %2836 }
 0x474   : > { %v3322_v23 = vadd.f32 %v4422_v2, %v5712_v12  ;;  %v3313_v43 = vpop.f32.mrb[77].mxu0 }
 0x475   : > { %v3314_v34 = vadd.f32 %v3313_v43, %v5700_v1  ;;  %v4423_v16 = vpop.f32.mrb[78].mxu0 }
 0x476   : > { %v3325_v26 = vadd.f32 %v4423_v16, %v5933_v51  ;;  %v3316_v20 = vpop.f32.mrb[79].mxu0  ;;  %v3522_v33 = vmax.f32 %v3322_v23, 0.0 }
 0x477   : > { %v3317_v57 = vadd.f32 %v3316_v20, %v5927_v36  ;;  %v3520_v58 = vmax.f32 %v3314_v34, 0.0 }
 0x478   : > { %v3523_v6 = vmax.f32 %v3325_v26, 0.0  ;;  %v5997_v26 = vpop.permute.xlu1 %2926 }
 0x479   : > { %v3521_v9 = vmax.f32 %v3317_v57, 0.0 }
 0x47a   : > { %v3577_v62 = vpack.c.bf16 %v3523_v6, %v3522_v33 }
 0x47b   : > { %v3576_v49 = vpack.c.bf16 %v3521_v9, %v3520_v58  ;;  %v4426_v46 = vpop.f32.mrb[80].mxu0 }
 0x47c   : > { %v3338_v12 = vadd.f32 %v4426_v46, %v5732_v28  ;;  %v3329_v35 = vpop.f32.mrb[81].mxu0 }
 0x47d   : > { %v3330_v1 = vadd.f32 %v3329_v35, %v5723_v42  ;;  %v4427_v51 = vpop.f32.mrb[82].mxu0  ;;  %4184 = vmatprep.subr.bf16.mxu1 %v3576_v49 }
 0x47e   : > { %v3341_v19 = vadd.f32 %v4427_v51, %v5937_v3  ;;  %v3332_v2 = vpop.f32.mrb[83].mxu0  ;;  %4185 = vmatpush3.bf16.msra.mxu1 %v5955_v22  ;;  %v3526_v23 = vmax.f32 %v3338_v12, 0.0 }
 0x47f   : > { %v3333_v36 = vadd.f32 %v3332_v2, %v5935_v7  ;;  %4186 = vmatprep.subr.bf16.mxu1 %v3577_v62  ;;  %v3524_v34 = vmax.f32 %v3330_v1, 0.0  ;;  %v6004_v62 = vpop.permute.xlu1 %2846 }
 0x480   : > { %v3527_v43 = vmax.f32 %v3341_v19, 0.0 }
 0x481   : > { %v3525_v16 = vmax.f32 %v3333_v36, 0.0 }
 0x482   : > { %v3579_v28 = vpack.c.bf16 %v3527_v43, %v3526_v23  ;;  %4187 = vmatpush3.bf16.msra.mxu1 %v5953_v11 }
 0x483   : > { %v3578_v42 = vpack.c.bf16 %v3525_v16, %v3524_v34  ;;  %v4430_v20 = vpop.f32.mrb[84].mxu0  ;;  %v6011_v19 = vpop.permute.xlu1 %2936 }
 0x484   : > { %v3354_v57 = vadd.f32 %v4430_v20, %v5744_v56  ;;  %v3345_v3 = vpop.f32.mrb[85].mxu0 }
 0x485   : > { %v3346_v33 = vadd.f32 %v3345_v3, %v5740_v30  ;;  %v4431_v22 = vpop.f32.mrb[86].mxu0  ;;  %4188 = vmatprep.subr.bf16.mxu1 %v3578_v42 }
 0x486   : > { %v3357_v7 = vadd.f32 %v4431_v22, %v5941_v60  ;;  %v3348_v6 = vpop.f32.mrb[87].mxu0  ;;  %4189 = vmatpush3.bf16.msra.mxu1 %v5963_v21  ;;  %v3530_v11 = vmax.f32 %v3354_v57, 0.0 }
 0x487   : > { %v3349_v58 = vadd.f32 %v3348_v6, %v5939_v53  ;;  %4190 = vmatprep.subr.bf16.mxu1 %v3579_v28  ;;  %v3528_v49 = vmax.f32 %v3346_v33, 0.0  ;;  %v2857_v28 = vpop.permute.xlu1 %2856 }
 0x488   : > { %v3531_v9 = vmax.f32 %v3357_v7, 0.0 }
 0x489   : > { %v3529_v46 = vmax.f32 %v3349_v58, 0.0 }
 0x48a   : > { %v3581_v56 = vpack.c.bf16 %v3531_v9, %v3530_v11  ;;  %4191 = vmatpush3.bf16.msra.mxu1 %v5961_v55 }
 0x48b   : > { %v3580_v30 = vpack.c.bf16 %v3529_v46, %v3528_v49  ;;  %v4434_v12 = vpop.f32.mrb[88].mxu0 }
 0x48c   : > { %v3370_v35 = vadd.f32 %v4434_v12, %v5752_v61  ;;  %v3361_v60 = vpop.f32.mrb[89].mxu0 }
 0x48d   : > { %v3362_v1 = vadd.f32 %v3361_v60, %v5748_v45  ;;  %v4435_v21 = vpop.f32.mrb[90].mxu0  ;;  %4192 = vmatprep.subr.bf16.mxu1 %v3580_v30 }
 0x48e   : > { %v3373_v53 = vadd.f32 %v4435_v21, %v5945_v38  ;;  %v3364_v51 = vpop.f32.mrb[91].mxu0  ;;  %4193 = vmatpush3.bf16.msra.mxu1 %v5973_v18  ;;  %v3534_v55 = vmax.f32 %v3370_v35, 0.0 }
 0x48f   : > { %v3365_v2 = vadd.f32 %v3364_v51, %v5943_v5  ;;  %4194 = vmatprep.subr.bf16.mxu1 %v3581_v56  ;;  %v3532_v23 = vmax.f32 %v3362_v1, 0.0 }
 0x490   : > { %v3535_v36 = vmax.f32 %v3373_v53, 0.0 }
 0x491   : > { %v3533_v43 = vmax.f32 %v3365_v2, 0.0 }
 0x492   : > { %v3583_v61 = vpack.c.bf16 %v3535_v36, %v3534_v55  ;;  %4195 = vmatpush3.bf16.msra.mxu1 %v5969_v8  ;;  %v6023_v8 = vld [vmem:[%s6142_s4 + $0x8] sm:$0xff] }
 0x493   : > { %v3582_v45 = vpack.c.bf16 %v3533_v43, %v3532_v23  ;;  %v4438_v34 = vpop.f32.mrb[92].mxu0 }
 0x494   : > { %v3386_v16 = vadd.f32 %v4438_v34, %v5766_v50  ;;  %v3377_v38 = vpop.f32.mrb[93].mxu0 }
 0x495   : > { %v3378_v18 = vadd.f32 %v3377_v38, %v5762_v10  ;;  %v4439_v42 = vpop.f32.mrb[94].mxu0  ;;  %4196 = vmatprep.subr.bf16.mxu1 %v3582_v45 }
 0x496   : > { %v3389_v5 = vadd.f32 %v4439_v42, %v5966_v29  ;;  %v3380_v20 = vpop.f32.mrb[95].mxu0  ;;  %4197 = vmatpush3.bf16.msra.mxu1 %v5981_v31  ;;  %v3538_v50 = vmax.f32 %v3386_v16, 0.0  ;;  %v4011_v29 = vcombine.high %v6023_v8, %v6023_v8  ;;  %v6030_v31 = vpop.permute.xlu1 %2946 }
 0x497   : > { %v3381_v57 = vadd.f32 %v3380_v20, %v5951_v25  ;;  %4198 = vmatprep.subr.bf16.mxu1 %v3583_v61  ;;  %v3536_v33 = vmax.f32 %v3378_v18, 0.0 }
 0x498   : > { %v3539_v3 = vmax.f32 %v3389_v5, 0.0 }
 0x499   : > { %v3537_v22 = vmax.f32 %v3381_v57, 0.0 }
 0x49a   : > { %v6025_v10 = vpack.c.bf16 %v3539_v3, %v3538_v50  ;;  %4199 = vmatpush3.bf16.msra.mxu1 %v5979_v24  ;;  %v2867_v12 = vpop.permute.xlu1 %2866 }
 0x49b   : > { %v6032_v25 = vpack.c.bf16 %v3537_v22, %v3536_v33  ;;  %v4442_v7 = vpop.f32.mrb[96].mxu0 }
 0x49c   : > { %v3402_v6 = vadd.f32 %v4442_v7, %v5778_v59  ;;  %v3393_v58 = vpop.f32.mrb[97].mxu0 }
 0x49d   : > { %v3394_v11 = vadd.f32 %v3393_v58, %v5774_v54  ;;  %v4443_v9 = vpop.f32.mrb[98].mxu0  ;;  %3655 = vmatmul.mubr.bf16.vlgmr.msra.gmra.mrb[76].mxu1 %v5641_v44 }
 0x49e   : > { %v3405_v49 = vadd.f32 %v4443_v9, %v5990_v14  ;;  %v3396_v46 = vpop.f32.mrb[99].mxu0  ;;  %3694 = vmatprep.mubr.bf16.mxu1 %v4011_v29  ;;  %v3542_v56 = vmax.f32 %v3402_v6, 0.0  ;;  %v6045_v55 = vpop.permute.xlu1 %2956 }
 0x49f   : > { %v3397_v24 = vadd.f32 %v3396_v46, %v5977_v47  ;;  %v3540_v35 = vmax.f32 %v3394_v11, 0.0 }
 0x4a0   : > { %v3543_v30 = vmax.f32 %v3405_v49, 0.0 }
 0x4a1   : > { %v3541_v60 = vmax.f32 %v3397_v24, 0.0 }
 0x4a2   : > { %v6039_v1 = vpack.c.bf16 %v3543_v30, %v3542_v56 }
 0x4a3   : > { %v6041_v59 = vpack.c.bf16 %v3541_v60, %v3540_v35  ;;  %v4446_v21 = vpop.f32.mrb[100].mxu0 }
 0x4a4   : > { %v3418_v54 = vadd.f32 %v4446_v21, %v5790_v15  ;;  %v3409_v53 = vpop.f32.mrb[101].mxu0 }
 0x4a5   : > { %v3410_v44 = vadd.f32 %v3409_v53, %v5786_v41  ;;  %v4447_v14 = vpop.f32.mrb[102].mxu0  ;;  %v2877_v41 = vpop.permute.xlu1 %2876 }
 0x4a6   : > { %v3421_v51 = vadd.f32 %v4447_v14, %v2857_v28  ;;  %v3412_v2 = vpop.f32.mrb[103].mxu0  ;;  %v3546_v36 = vmax.f32 %v3418_v54, 0.0 }
 0x4a7   : > { %v3413_v47 = vadd.f32 %v3412_v2, %v6004_v62  ;;  %v3544_v43 = vmax.f32 %v3410_v44, 0.0 }
 0x4a8   : > { %v3547_v23 = vmax.f32 %v3421_v51, 0.0 }
 0x4a9   : > { %v3545_v61 = vmax.f32 %v3413_v47, 0.0 }
 0x4aa   : > { %v6048_v45 = vpack.c.bf16 %v3547_v23, %v3546_v36 }
 0x4ab   : > { %v6050_v34 = vpack.c.bf16 %v3545_v61, %v3544_v43  ;;  %v4450_v16 = vpop.f32.mrb[104].mxu0 }
 0x4ac   : > { %v3434_v15 = vadd.f32 %v4450_v16, %v5798_v52  ;;  %v3425_v38 = vpop.f32.mrb[105].mxu0 }
 0x4ad   : > { %v3426_v28 = vadd.f32 %v3425_v38, %v5794_v37  ;;  %v4451_v18 = vpop.f32.mrb[106].mxu0 }
 0x4ae   : > { %v3437_v42 = vadd.f32 %v4451_v18, %v2877_v41  ;;  %v3428_v5 = vpop.f32.mrb[107].mxu0  ;;  %v3550_v62 = vmax.f32 %v3434_v15, 0.0 }
 0x4af   : > { %v3429_v20 = vadd.f32 %v3428_v5, %v2867_v12  ;;  %v3548_v50 = vmax.f32 %v3426_v28, 0.0 }
 0x4b0   : > { %v3551_v57 = vmax.f32 %v3437_v42, 0.0  ;;  %v6199_v42 = vld [vmem:[#allocation8_spill] sm:$0xff] }
 0x4b1   : > { %v3549_v3 = vmax.f32 %v3429_v20, 0.0 }
 0x4b2   : > { %v6054_v33 = vpack.c.bf16 %v3551_v57, %v3550_v62 }
 0x4b3   : > { %v6056_v22 = vpack.c.bf16 %v3549_v3, %v3548_v50  ;;  %v4454_v29 = vpop.f32.mrb[108].mxu0 }
 0x4b4   : > { %v3450_v7 = vadd.f32 %v4454_v29, %v5764_v63  ;;  %v3441_v52 = vpop.f32.mrb[109].mxu0 }
 0x4b5   : > { %v3442_v6 = vadd.f32 %v3441_v52, %v5760_v13  ;;  %v4455_v58 = vpop.f32.mrb[110].mxu0 }
 0x4b6   : > { %v3453_v37 = vadd.f32 %v4455_v58, %v5959_v17  ;;  %v3444_v11 = vpop.f32.mrb[111].mxu0  ;;  %v3554_v49 = vmax.f32 %v3450_v7, 0.0  ;;  %v3606_v58 = vpop.permute.xlu1 %3605 }
 0x4b7   : > { %v3445_v9 = vadd.f32 %v3444_v11, %v5947_v39  ;;  %v3552_v24 = vmax.f32 %v3442_v6, 0.0 }
 0x4b8   : > { %v3555_v46 = vmax.f32 %v3453_v37, 0.0 }
 0x4b9   : > { %v3553_v56 = vmax.f32 %v3445_v9, 0.0 }
 0x4ba   : > { %v3593_v30 = vpack.c.bf16 %v3555_v46, %v3554_v49 }
 0x4bb   : > { %v3592_v12 = vpack.c.bf16 %v3553_v56, %v3552_v24  ;;  %v4458_v35 = vpop.f32.mrb[112].mxu0 }
 0x4bc   : > { %v3466_v60 = vadd.f32 %v4458_v35, %v5776_v48  ;;  %v3457_v21 = vpop.f32.mrb[113].mxu0 }
 0x4bd   : > { %v3458_v63 = vadd.f32 %v3457_v21, %v5772_v4  ;;  %v4459_v54 = vpop.f32.mrb[114].mxu0  ;;  %4206 = vmatprep.subr.bf16.mxu1 %v3592_v12 }
 0x4be   : > { %v3469_v13 = vadd.f32 %v4459_v54, %v5986_v27  ;;  %v3460_v17 = vpop.f32.mrb[115].mxu0  ;;  %4207 = vmatpush3.bf16.msra.mxu1 %v6032_v25  ;;  %v3558_v53 = vmax.f32 %v3466_v60, 0.0 }
 0x4bf   : > { %v3461_v39 = vadd.f32 %v3460_v17, %v5971_v32  ;;  %4208 = vmatprep.subr.bf16.mxu1 %v3593_v30  ;;  %v3556_v14 = vmax.f32 %v3458_v63, 0.0 }
 0x4c0   : > { %v3559_v44 = vmax.f32 %v3469_v13, 0.0 }
 0x4c1   : > { %v3557_v51 = vmax.f32 %v3461_v39, 0.0 }
 0x4c2   : > { %v3595_v2 = vpack.c.bf16 %v3559_v44, %v3558_v53  ;;  %4209 = vmatpush3.bf16.msra.mxu1 %v6025_v10 }
 0x4c3   : > { %v3594_v48 = vpack.c.bf16 %v3557_v51, %v3556_v14  ;;  %v4462_v47 = vpop.f32.mrb[116].mxu0 }
 0x4c4   : > { %v3482_v4 = vadd.f32 %v4462_v47, %v5788_v40  ;;  %v3473_v36 = vpop.f32.mrb[117].mxu0 }
 0x4c5   : > { %v3474_v27 = vadd.f32 %v3473_v36, %v5783_v0  ;;  %v4463_v23 = vpop.f32.mrb[118].mxu0  ;;  %4210 = vmatprep.subr.bf16.mxu1 %v3594_v48  ;;  %v6198_v0 = vld [vmem:[#allocation6_spill] sm:$0xff] }
 0x4c6   : > { %v3485_v25 = vadd.f32 %v4463_v23, %v6011_v19  ;;  %v3476_v32 = vpop.f32.mrb[119].mxu0  ;;  %4211 = vmatpush3.bf16.msra.mxu1 %v6041_v59  ;;  %v3562_v61 = vmax.f32 %v3482_v4, 0.0 }
 0x4c7   : > { %v3477_v43 = vadd.f32 %v3476_v32, %v5997_v26  ;;  %4212 = vmatprep.subr.bf16.mxu1 %v3595_v2  ;;  %v3560_v10 = vmax.f32 %v3474_v27, 0.0 }
 0x4c8   : > { %v3563_v16 = vmax.f32 %v3485_v25, 0.0 }
 0x4c9   : > { %v3561_v15 = vmax.f32 %v3477_v43, 0.0 }
 0x4ca   : > { %v3597_v38 = vpack.c.bf16 %v3563_v16, %v3562_v61  ;;  %4213 = vmatpush3.bf16.msra.mxu1 %v6039_v1 }
 0x4cb   : > { %v3596_v40 = vpack.c.bf16 %v3561_v15, %v3560_v10  ;;  %v4466_v41 = vpop.f32.mrb[120].mxu0 }
 0x4cc   : > { %v3498_v28 = vadd.f32 %v4466_v41, %v6198_v0  ;;  %v3489_v18 = vpop.f32.mrb[121].mxu0 }
 0x4cd   : > { %v3490_v19 = vadd.f32 %v3489_v18, %v6199_v42  ;;  %v4467_v5 = vpop.f32.mrb[122].mxu0  ;;  %4214 = vmatprep.subr.bf16.mxu1 %v3596_v40 }
 0x4ce   : > { %v3501_v59 = vadd.f32 %v4467_v5, %v6045_v55  ;;  %v3492_v26 = vpop.f32.mrb[123].mxu0  ;;  %4215 = vmatpush3.bf16.msra.mxu1 %v6050_v34  ;;  %v3566_v62 = vmax.f32 %v3498_v28, 0.0  ;;  %v4010_v55 = vcombine.low %v6023_v8, %v6023_v8 }
 0x4cf   : > { %v3493_v20 = vadd.f32 %v3492_v26, %v6030_v31  ;;  %4216 = vmatprep.subr.bf16.mxu1 %v3597_v38  ;;  %v3564_v1 = vmax.f32 %v3490_v19, 0.0 }
 0x4d0   : > { %v3567_v57 = vmax.f32 %v3501_v59, 0.0 }
 0x4d1   : > { %v3565_v50 = vmax.f32 %v3493_v20, 0.0 }
 0x4d2   : > { %v3599_v3 = vpack.c.bf16 %v3567_v57, %v3566_v62  ;;  %4217 = vmatpush3.bf16.msra.mxu1 %v6048_v45 }
 0x4d3   : > { %v3598_v29 = vpack.c.bf16 %v3565_v50, %v3564_v1 }
 0x4d5   : > { %4218 = vmatprep.subr.bf16.mxu1 %v3598_v29 }
 0x4d6   : > { %4219 = vmatpush3.bf16.msra.mxu1 %v6056_v22 }
 0x4d7   : > { %4220 = vmatprep.subr.bf16.mxu1 %v3599_v3 }
 0x4da   : > { %4221 = vmatpush3.bf16.msra.mxu1 %v6054_v33 }
 0x4dd   : > { %3695 = vmatmul.mubr.bf16.vlgmr.msra.gmra.mrb[80].mxu1 %v4010_v55 }
 0x570   : > { %v4200_v31 = vpop.f32.mrb[76].mxu1 }
 0x571   : > { %v4201_v34 = vpop.f32.mrb[77].mxu1 }
 0x572   : > { %v4202_v7 = vadd.f32 %v4201_v34, %v4200_v31  ;;  %v4203_v52 = vpop.f32.mrb[78].mxu1 }
 0x573   : > { %v4204_v6 = vpop.f32.mrb[79].mxu1 }
 0x574   : > { %v3657_v37 = vadd.f32 %v4202_v7, %v3606_v58 }
 0x5b0   : > { %v4222_v45 = vpop.f32.mrb[80].mxu1 }
 0x5b1   : > { %v4223_v22 = vpop.f32.mrb[81].mxu1 }
 0x5b2   : > { %v4224_v11 = vadd.f32 %v4223_v22, %v4222_v45  ;;  %v4225_v9 = vpop.f32.mrb[82].mxu1 }
 0x5b3   : > { %v4226_v8 = vpop.f32.mrb[83].mxu1 }
 0x5b4   : > { %v3697_v33 = vadd.f32 %v4224_v11, %v3657_v37 }
 0x5b6   : > { %4012 = vst.msk [vmem:[%s5803_s29 + $0x8] sm:$0xff] %vm279_vm0, %v3697_v33 }
 0x5b7   : > { %4623 = shalt.err (!%p4620_p3)
}
 0x5b8   : > { %s4624_s20 = scalar_lea.hbm %s6089_s11, 256  ;;  %s4628_s17 = scalar_lea.hbm %s6144_s6, 512 }
 0x5b9   : > { %p4625_p4 = scmp.ne.s32.totalorder %s6089_s11, %s4624_s20  ;;  %p4629_p9 = scmp.lt.u32.totalorder %s6089_s11, %s6144_s6 }
 0x5ba   : > { %p4630_p10 = scmp.lt.u32.totalorder %s4628_s17, %s4624_s20  ;;  %p4632_p12 = scmp.lt.u32.totalorder %s4624_s20, %s6089_s11 }
 0x5bb   : > { %p4626_p7 = pnand %p4625_p4, %p4751_p5 }
 0x5bc   : > { %p4631_p11 = por %p4630_p10, %p4629_p9 }
 0x5bd   : > { %p4627_p8 = pneg %p4626_p7 }
 0x5be   : > { %p4633_p13 = por %p4632_p12, %p4631_p11 }
 0x5c0   : > { %p4634_p0 = pnand %p4633_p13, %p4627_p8 }
 0x5c2   : > { %4637 = shalt.err (!%p4634_p0)
}
 0x5c3   : > { %s4676_s9 = smov 128   ;;  %s4677_s10 = smov 8  }
 0x5c4   : > { %4476 = dma.vmem_to_hbm [thread:$0]  (%p4751_p5), %s6091_s28, 256, %s6089_s11, %s6097_s25, %s4676_s9, %s4676_s9, %s4677_s10  }
 0x5c5 PF: > { %p4482_p1 = scmp.ge.s32.totalorder %s4672_s24, 2  ;;  %s3733_s26 = sand.u32 1, %s4660_s21  }
 0x5c6   : > { %s3734_s12 = scalar_lea.sflag [#allocation3], %s3733_s26 }
 0x5c7   : > { %p4479_p2 = pnand %p4482_p1, %p4755_p6 }
 0x5c9   : > { %4655 = dma.done.wait (!%p4479_p2), %s3734_s12, 256  }
 0x5ca   : > { %4657 = vsyncadd (!%p4479_p2), %s3734_s12, 4294967040  ;;  %p16_p3 = scmp.ge.s32.totalorder %s4738_s27, 4   ;;  %s6200_s21 = smov %s4664_s22 }
 0x5cb   : > { %s6201_s22 = smov %s4668_s23  ;;  %s6202_s23 = smov %s4749_s30 }
 0x5cc   : > { %s6203_s24 = smov %s4738_s27  ;;  %18 = sbr.rel (!%p16_p3) target bundleno = 3 (0x3), region = 88 }
 0x5d3   :  { %3739 = vsyncpa [#allocation3], 1 }
 0x5d4   :  { %3741 = vsyncpa [#allocation3 + $0x1], 1 }

</bundles_post_ra>
